<compile_context>
chip_gen: v5e
topology: v5e:2x2
jax: 0.10.0
libtpu: 0.0.40
codegen_flags: <defaults>
</compile_context>

<pallas_src>
import functools

import jax
import jax.numpy as jnp
from jax import lax
from jax.experimental import pallas as pl
from jax.experimental.pallas import tpu as pltpu


def _round_up(x, m):
    return (x + m - 1) // m * m


def _log_sigmoid(x):
    # numerically stable log(sigmoid(x)) = min(x, 0) - log1p(exp(-|x|))
    return jnp.minimum(x, 0.0) - jnp.log1p(jnp.exp(-jnp.abs(x)))


# ---------------------------------------------------------------------------
# Kernel: one batch tile per grid step.
#   tok_ref  (B_pad, L) int32      scalar-prefetched token ids (SMEM)
#   emb_hbm  (V, H)                embedding table, stays in HBM (pl.ANY)
#   wlm_hbm  (V, H)                LM head rows (transposed), HBM (pl.ANY)
#   w1/b1/w2/b2                    classifier-head params (VMEM / SMEM)
#   sig_ref  (tb, 1) f32           logsigmoid(phi logits)
#   lm_ref   (tb, 1) f32           sum_l <emb[b,l], w_lm[:, tok[b,l]]>
# ---------------------------------------------------------------------------
def _mt_kernel(tok_ref, *args, with_lm, tb, seq_len, inv_len):
    if with_lm:
        (emb_hbm, wlm_hbm, w1_ref, b1_ref, w2_ref, b2_ref,
         sig_ref, lm_ref,
         ebuf, wbuf, pooled_acc, lm_acc, esem, wsem) = args
    else:
        (emb_hbm, w1_ref, b1_ref, w2_ref, b2_ref,
         sig_ref,
         ebuf, pooled_acc, esem) = args
        wlm_hbm = wbuf = lm_ref = lm_acc = wsem = None

    bi = pl.program_id(0)

    # --- token-driven row gather (data-dependent DMA from HBM) -------------
    def start_pos(l, slot):
        # One (1, H) row DMA per (table, batch-row).  tb is small and static
        # here; switch the row loop to lax.fori_loop for large batch tiles.
        for r in range(tb):
            t = tok_ref[bi * tb + r, l]
            pltpu.make_async_copy(
                emb_hbm.at[pl.ds(t, 1), :],
                ebuf.at[slot, pl.ds(r, 1), :],
                esem.at[slot, r]).start()
            if with_lm:
                pltpu.make_async_copy(
                    wlm_hbm.at[pl.ds(t, 1), :],
                    wbuf.at[slot, pl.ds(r, 1), :],
                    wsem.at[slot, r]).start()

    def wait_pos(slot):
        for r in range(tb):
            pltpu.make_async_copy(
                emb_hbm.at[pl.ds(0, 1), :],
                ebuf.at[slot, pl.ds(r, 1), :],
                esem.at[slot, r]).wait()
            if with_lm:
                pltpu.make_async_copy(
                    wlm_hbm.at[pl.ds(0, 1), :],
                    wbuf.at[slot, pl.ds(r, 1), :],
                    wsem.at[slot, r]).wait()

    # Prime slot 0 with position 0, then zero accumulators while it flies.
    start_pos(0, 0)
    pooled_acc[...] = jnp.zeros_like(pooled_acc)
    if with_lm:
        lm_acc[...] = jnp.zeros_like(lm_acc)

    # --- double-buffered walk over the sequence ----------------------------
    def body(l, carry):
        slot = l % 2
        wait_pos(slot)

        @pl.when(l + 1 < seq_len)
        def _():
            start_pos(l + 1, 1 - slot)

        e = ebuf[slot].astype(jnp.float32)                     # (tb, H)
        pooled_acc[...] += e
        if with_lm:
            w = wbuf[slot].astype(jnp.float32)                 # (tb, H)
            # single fused reduction over H — no (tb, L) intermediate
            lm_acc[...] += jnp.sum(e * w, axis=-1, keepdims=True)
        return carry

    lax.fori_loop(0, seq_len, body, 0)

    # --- epilogue: mean-pool -> ReLU MLP (MXU, bf16 operands, f32 acc)
    #               -> single-output head -> logsigmoid ---------------------
    pooled = pooled_acc[...] * inv_len                          # (tb, H) f32
    h = jnp.dot(pooled.astype(w1_ref.dtype), w1_ref[...],
                preferred_element_type=jnp.float32)             # (tb, H)
    h = jnp.maximum(h + b1_ref[...], 0.0)
    # Single output column: VPU multiply + lane reduce (no N=1 MXU matmul).
    logit = jnp.sum(h * w2_ref[...], axis=-1, keepdims=True) + b2_ref[0]
    sig_ref[...] = _log_sigmoid(logit)                          # (tb, 1)
    if with_lm:
        lm_ref[...] = lm_acc[...]                               # (tb, 1)


# ---------------------------------------------------------------------------
# pallas_call wrapper
# ---------------------------------------------------------------------------
def _mt_pallas_call(tokens, params, *, with_lm, tb):
    B_pad, L = tokens.shape
    V, H = params["emb"].shape
    n_bt = B_pad // tb

    kernel = functools.partial(_mt_kernel, with_lm=with_lm, tb=tb,
                               seq_len=L, inv_len=1.0 / L)

    in_specs = [pl.BlockSpec(memory_space=pl.ANY)]              # emb (HBM)
    inputs = [params["emb"]]
    if with_lm:
        in_specs.append(pl.BlockSpec(memory_space=pl.ANY))      # w_lm_t (HBM)
        inputs.append(params["w_lm_t"])
    in_specs += [
        pl.BlockSpec((H, H), lambda i, tok: (0, 0)),            # w1 (bf16)
        pl.BlockSpec((1, H), lambda i, tok: (0, 0)),            # b1
        pl.BlockSpec((1, H), lambda i, tok: (0, 0)),            # w2
        pl.BlockSpec(memory_space=pltpu.MemorySpace.SMEM),      # b2 scalar
    ]
    inputs += [params["w1"], params["b1"], params["w2"], params["b2"]]

    out_shape = [jax.ShapeDtypeStruct((B_pad, 1), jnp.float32)]
    out_specs = [pl.BlockSpec((tb, 1), lambda i, tok: (i, 0))]
    if with_lm:
        out_shape.append(jax.ShapeDtypeStruct((B_pad, 1), jnp.float32))
        out_specs.append(pl.BlockSpec((tb, 1), lambda i, tok: (i, 0)))

    tbl_dtype = params["emb"].dtype
    scratch = [pltpu.VMEM((2, tb, H), tbl_dtype)]               # ebuf
    if with_lm:
        scratch.append(pltpu.VMEM((2, tb, H), params["w_lm_t"].dtype))  # wbuf
    scratch.append(pltpu.VMEM((tb, H), jnp.float32))            # pooled_acc
    if with_lm:
        scratch.append(pltpu.VMEM((tb, 1), jnp.float32))        # lm_acc
    scratch.append(pltpu.SemaphoreType.DMA((2, tb)))            # esem
    if with_lm:
        scratch.append(pltpu.SemaphoreType.DMA((2, tb)))        # wsem

    outs = pl.pallas_call(
        kernel,
        out_shape=tuple(out_shape),
        grid_spec=pltpu.PrefetchScalarGridSpec(
            num_scalar_prefetch=1,
            grid=(n_bt,),
            in_specs=in_specs,
            out_specs=tuple(out_specs),
            scratch_shapes=scratch),
        compiler_params=pltpu.CompilerParams(
            # batch tiles are independent -> shard across v7x's 2 TensorCores
            dimension_semantics=("parallel",),
            # explicit budget so the same kernel fits v7x's 64 MiB VMEM
            vmem_limit_bytes=48 * 1024 * 1024),
    )(tokens, *inputs)
    if not isinstance(outs, (tuple, list)):
        outs = (outs,)
    return outs


# ---------------------------------------------------------------------------
# ModulatedTarget.forward
# ---------------------------------------------------------------------------
def modulated_target_forward(particles, last_hidden_state, params, prefix,
                             particle_logprobs=None, batch_tile=None):
    del last_hidden_state  # unused in the reference forward as well
    B = particles.shape[0]
    P = prefix.shape[0]

    # prepend_tokens: repeat prefix over batch, concat along the sequence dim.
    k_prefixes = jnp.tile(prefix[None, :].astype(jnp.int32), (B, 1))
    tokens = jnp.concatenate([k_prefixes, particles.astype(jnp.int32)], axis=1)
    L = tokens.shape[1]

    # TODO(synk): tk.q_to_sigma (decode to strings + re-tokenize) has no
    # numeric equivalent; token ids are used directly with an all-ones mask.

    # Pad batch to a multiple of the batch tile (pad rows use token 0; their
    # results are computed and sliced off below).  At real B use 128-row tiles
    # so the MXU M dimension is full; at toy B just round up to the sublane.
    if batch_tile is None:
        batch_tile = 128 if B >= 128 else _round_up(B, 8)
    B_pad = _round_up(B, batch_tile)
    if B_pad != B:
        tokens = jnp.concatenate(
            [tokens, jnp.zeros((B_pad - B, L), jnp.int32)], axis=0)

    if particle_logprobs is not None:
        outs = _mt_pallas_call(tokens, params, with_lm=False, tb=batch_tile)
        sigma_logprob = outs[0][:B, 0]                          # (B,)
        return sigma_logprob + particle_logprobs

    outs = _mt_pallas_call(tokens, params, with_lm=True, tb=batch_tile)
    sigma_logprob = outs[0][:B, 0]                              # (B,)
    # Faithful to the reference: `logits[prefix:]` / `particles[prefix:]`
    # slice the *batch* dimension, then the (B-P, 1) logprob broadcasts
    # against the (B,) sigma_logprob -> (B-P, B).
    logprob = outs[1][P:B, 0][:, None]                          # (B-P, 1)
    return sigma_logprob + logprob                              # (B-P, B)


# ---------------------------------------------------------------------------
# Pure-JAX reference (for correctness check only)
# ---------------------------------------------------------------------------
def _reference_forward(particles, params, prefix, particle_logprobs=None):
    B = particles.shape[0]
    P = prefix.shape[0]
    tokens = jnp.concatenate(
        [jnp.tile(prefix[None, :], (B, 1)), particles], axis=1).astype(jnp.int32)
    emb = jnp.take(params["emb"].astype(jnp.float32), tokens, axis=0)
    pooled = jnp.mean(emb, axis=1)
    h = jnp.maximum(
        jnp.dot(pooled, params["w1"].astype(jnp.float32),
                precision=lax.Precision.HIGHEST) + params["b1"], 0.0)
    logit = jnp.sum(h * params["w2"], axis=-1) + params["b2"][0]
    sig = jnp.minimum(logit, 0.0) - jnp.log1p(jnp.exp(-jnp.abs(logit)))
    if particle_logprobs is not None:
        return sig + particle_logprobs
    wlm = params["w_lm_t"].astype(jnp.float32)
    logits = jnp.einsum("blh,vh->blv", emb, wlm, precision=lax.Precision.HIGHEST)
    gathered = jnp.take_along_axis(logits[P:], tokens[P:, :, None], axis=2)[..., 0]
    logprob = jnp.sum(gathered, axis=1, keepdims=True)
    return sig + logprob


if __name__ == "__main__":
    key = jax.random.PRNGKey(0)
    ks = jax.random.split(key, 10)

    V, H = 256, 128      # vocab, hidden
    B, Lp = 4, 8         # batch, particle sequence length
    prefix = jnp.array([1, 2], dtype=jnp.int32)   # tk.tok_q([s0]) stand-in

    params = {
        # Gathered tables stay f32 (single-sublane bf16 rows are sub-word DMA
        # destinations); LM head stored pre-transposed (V, H) so the per-token
        # column gather is a cheap row DMA.
        "emb":    0.02 * jax.random.normal(ks[0], (V, H), jnp.float32),
        "w_lm_t": 0.05 * jax.random.normal(ks[3], (V, H), jnp.float32),
        # MXU weight in bf16; activations are cast at the dot, f32 accumulate.
        "w1":     (0.05 * jax.random.normal(ks[1], (H, H), jnp.float32)
                   ).astype(jnp.bfloat16),
        "b1":     0.01 * jax.random.normal(ks[7], (1, H), jnp.float32),
        "w2":     0.05 * jax.random.normal(ks[2], (1, H), jnp.float32),
        "b2":     0.10 * jax.random.normal(ks[8], (1,), jnp.float32),
    }

    particles = jax.random.randint(ks[4], (B, Lp), 0, V, dtype=jnp.int32)
    last_hidden_state = jax.random.normal(ks[5], (B, Lp, H), jnp.float32)
    particle_logprobs = jax.random.normal(ks[6], (B,), jnp.float32)

    # branch 1: particle_logprobs given -> (B,)
    out_with_lp = modulated_target_forward(
        particles, last_hidden_state, params, prefix,
        particle_logprobs=particle_logprobs)

    # branch 2: particle_logprobs is None -> LM gather path -> (B-P, B)
    out_lm = modulated_target_forward(
        particles, last_hidden_state, params, prefix)

    jax.block_until_ready((out_with_lp, out_lm))
    assert out_with_lp.shape == (B,)
    assert out_lm.shape == (B - prefix.shape[0], B)

    # correctness vs pure-JAX reference
    ref_with_lp = _reference_forward(particles, params, prefix,
                                     particle_logprobs=particle_logprobs)
    ref_lm = _reference_forward(particles, params, prefix)
    assert jnp.allclose(out_with_lp, ref_with_lp, rtol=1e-2, atol=1e-3), (
        jnp.max(jnp.abs(out_with_lp - ref_with_lp)))
    assert jnp.allclose(out_lm, ref_lm, rtol=1e-2, atol=1e-3), (
        jnp.max(jnp.abs(out_lm - ref_lm)))

    print("KERNEL_OK")
</pallas_src>

<mosaic_0001>
module attributes {stable_mosaic.version = 11 : i64} {
  func.func @_mt_kernel(%arg0: i32, %arg1: memref<8x10xi32, #tpu.memory_space<smem>>, %arg2: memref<256x128xf32, #tpu.memory_space<any>>, %arg3: memref<128x128xbf16, #tpu.memory_space<vmem>>, %arg4: memref<1x128xf32, #tpu.memory_space<vmem>>, %arg5: memref<1x128xf32, #tpu.memory_space<vmem>>, %arg6: memref<1xf32, #tpu.memory_space<smem>>, %arg7: memref<8x1xf32, #tpu.memory_space<vmem>>, %arg8: memref<2x8x128xf32, #tpu.memory_space<vmem>>, %arg9: memref<8x128xf32, #tpu.memory_space<vmem>>, %arg10: memref<2x8x!tpu.dma_semaphore, #tpu.memory_space<semaphore_mem>>) attributes {dimension_semantics = [#tpu.dimension_semantics<parallel>], iteration_bounds = array<i64: 1>, scalar_prefetch = 1 : i64, scratch_operands = 3 : i64, tpu.core_type = #tpu.core_type<tc>, window_params = [{}, {pipeline_mode = #tpu.pipeline_mode<synchronous>, transform_indices = @transform_1, window_bounds = array<i64: 128, 128>}, {pipeline_mode = #tpu.pipeline_mode<synchronous>, transform_indices = @transform_2, window_bounds = array<i64: 1, 128>}, {pipeline_mode = #tpu.pipeline_mode<synchronous>, transform_indices = @transform_3, window_bounds = array<i64: 1, 128>}, {transform_indices = @transform_4, window_bounds = array<i64: 1>}, {transform_indices = @transform_5, window_bounds = array<i64: 8, 1>}]} {
    %c8_i32 = arith.constant 8 : i32
    %0 = arith.muli %arg0, %c8_i32 : i32
    %c0_i32 = arith.constant 0 : i32
    %1 = arith.addi %0, %c0_i32 : i32
    %2 = arith.index_cast %1 : i32 to index
    %c0 = arith.constant 0 : index
    %3 = memref.load %arg1[%2, %c0] : memref<8x10xi32, #tpu.memory_space<smem>>
    %c0_i32_0 = arith.constant 0 : i32
    %c0_i32_1 = arith.constant 0 : i32
    %c0_i32_2 = arith.constant 0 : i32
    %c0_i32_3 = arith.constant 0 : i32
    %4 = tpu.memref_slice %arg2[%3, %c0_i32_3] : memref<256x128xf32, #tpu.memory_space<any>> -> memref<1x128xf32, #tpu.memory_space<any>>
    %c0_i32_4 = arith.constant 0 : i32
    %c0_i32_5 = arith.constant 0 : i32
    %5 = tpu.memref_slice %arg8[%c0_i32_0, %c0_i32_4, %c0_i32_5] : memref<2x8x128xf32, #tpu.memory_space<vmem>> -> memref<1x1x128xf32, #tpu.memory_space<vmem>>
    %6 = tpu.memref_squeeze %5 : memref<1x1x128xf32, #tpu.memory_space<vmem>> -> memref<1x128xf32, #tpu.memory_space<vmem>>
    %7 = tpu.memref_slice %arg10[%c0_i32_1, %c0_i32_2] : memref<2x8x!tpu.dma_semaphore, #tpu.memory_space<semaphore_mem>> -> memref<1x1x!tpu.dma_semaphore, #tpu.memory_space<semaphore_mem>>
    %8 = tpu.memref_squeeze %7 : memref<1x1x!tpu.dma_semaphore, #tpu.memory_space<semaphore_mem>> -> memref<!tpu.dma_semaphore, #tpu.memory_space<semaphore_mem>>
    tpu.enqueue_dma source(%4 : memref<1x128xf32, #tpu.memory_space<any>>) target(%6 : memref<1x128xf32, #tpu.memory_space<vmem>>) target_semaphore(%8 : memref<!tpu.dma_semaphore, #tpu.memory_space<semaphore_mem>>)
    %c8_i32_6 = arith.constant 8 : i32
    %9 = arith.muli %arg0, %c8_i32_6 : i32
    %c1_i32 = arith.constant 1 : i32
    %10 = arith.addi %9, %c1_i32 : i32
    %11 = arith.index_cast %10 : i32 to index
    %c0_7 = arith.constant 0 : index
    %12 = memref.load %arg1[%11, %c0_7] : memref<8x10xi32, #tpu.memory_space<smem>>
    %c0_i32_8 = arith.constant 0 : i32
    %c0_i32_9 = arith.constant 0 : i32
    %c1_i32_10 = arith.constant 1 : i32
    %c0_i32_11 = arith.constant 0 : i32
    %13 = tpu.memref_slice %arg2[%12, %c0_i32_11] : memref<256x128xf32, #tpu.memory_space<any>> -> memref<1x128xf32, #tpu.memory_space<any>>
    %c1_i32_12 = arith.constant 1 : i32
    %c0_i32_13 = arith.constant 0 : i32
    %14 = tpu.memref_slice %arg8[%c0_i32_8, %c1_i32_12, %c0_i32_13] : memref<2x8x128xf32, #tpu.memory_space<vmem>> -> memref<1x1x128xf32, #tpu.memory_space<vmem>>
    %15 = tpu.memref_squeeze %14 : memref<1x1x128xf32, #tpu.memory_space<vmem>> -> memref<1x128xf32, #tpu.memory_space<vmem>>
    %16 = tpu.memref_slice %arg10[%c0_i32_9, %c1_i32_10] : memref<2x8x!tpu.dma_semaphore, #tpu.memory_space<semaphore_mem>> -> memref<1x1x!tpu.dma_semaphore, #tpu.memory_space<semaphore_mem>>
    %17 = tpu.memref_squeeze %16 : memref<1x1x!tpu.dma_semaphore, #tpu.memory_space<semaphore_mem>> -> memref<!tpu.dma_semaphore, #tpu.memory_space<semaphore_mem>>
    tpu.enqueue_dma source(%13 : memref<1x128xf32, #tpu.memory_space<any>>) target(%15 : memref<1x128xf32, #tpu.memory_space<vmem>>) target_semaphore(%17 : memref<!tpu.dma_semaphore, #tpu.memory_space<semaphore_mem>>)
    %c8_i32_14 = arith.constant 8 : i32
    %18 = arith.muli %arg0, %c8_i32_14 : i32
    %c2_i32 = arith.constant 2 : i32
    %19 = arith.addi %18, %c2_i32 : i32
    %20 = arith.index_cast %19 : i32 to index
    %c0_15 = arith.constant 0 : index
    %21 = memref.load %arg1[%20, %c0_15] : memref<8x10xi32, #tpu.memory_space<smem>>
    %c0_i32_16 = arith.constant 0 : i32
    %c0_i32_17 = arith.constant 0 : i32
    %c2_i32_18 = arith.constant 2 : i32
    %c0_i32_19 = arith.constant 0 : i32
    %22 = tpu.memref_slice %arg2[%21, %c0_i32_19] : memref<256x128xf32, #tpu.memory_space<any>> -> memref<1x128xf32, #tpu.memory_space<any>>
    %c2_i32_20 = arith.constant 2 : i32
    %c0_i32_21 = arith.constant 0 : i32
    %23 = tpu.memref_slice %arg8[%c0_i32_16, %c2_i32_20, %c0_i32_21] : memref<2x8x128xf32, #tpu.memory_space<vmem>> -> memref<1x1x128xf32, #tpu.memory_space<vmem>>
    %24 = tpu.memref_squeeze %23 : memref<1x1x128xf32, #tpu.memory_space<vmem>> -> memref<1x128xf32, #tpu.memory_space<vmem>>
    %25 = tpu.memref_slice %arg10[%c0_i32_17, %c2_i32_18] : memref<2x8x!tpu.dma_semaphore, #tpu.memory_space<semaphore_mem>> -> memref<1x1x!tpu.dma_semaphore, #tpu.memory_space<semaphore_mem>>
    %26 = tpu.memref_squeeze %25 : memref<1x1x!tpu.dma_semaphore, #tpu.memory_space<semaphore_mem>> -> memref<!tpu.dma_semaphore, #tpu.memory_space<semaphore_mem>>
    tpu.enqueue_dma source(%22 : memref<1x128xf32, #tpu.memory_space<any>>) target(%24 : memref<1x128xf32, #tpu.memory_space<vmem>>) target_semaphore(%26 : memref<!tpu.dma_semaphore, #tpu.memory_space<semaphore_mem>>)
    %c8_i32_22 = arith.constant 8 : i32
    %27 = arith.muli %arg0, %c8_i32_22 : i32
    %c3_i32 = arith.constant 3 : i32
    %28 = arith.addi %27, %c3_i32 : i32
    %29 = arith.index_cast %28 : i32 to index
    %c0_23 = arith.constant 0 : index
    %30 = memref.load %arg1[%29, %c0_23] : memref<8x10xi32, #tpu.memory_space<smem>>
    %c0_i32_24 = arith.constant 0 : i32
    %c0_i32_25 = arith.constant 0 : i32
    %c3_i32_26 = arith.constant 3 : i32
    %c0_i32_27 = arith.constant 0 : i32
    %31 = tpu.memref_slice %arg2[%30, %c0_i32_27] : memref<256x128xf32, #tpu.memory_space<any>> -> memref<1x128xf32, #tpu.memory_space<any>>
    %c3_i32_28 = arith.constant 3 : i32
    %c0_i32_29 = arith.constant 0 : i32
    %32 = tpu.memref_slice %arg8[%c0_i32_24, %c3_i32_28, %c0_i32_29] : memref<2x8x128xf32, #tpu.memory_space<vmem>> -> memref<1x1x128xf32, #tpu.memory_space<vmem>>
    %33 = tpu.memref_squeeze %32 : memref<1x1x128xf32, #tpu.memory_space<vmem>> -> memref<1x128xf32, #tpu.memory_space<vmem>>
    %34 = tpu.memref_slice %arg10[%c0_i32_25, %c3_i32_26] : memref<2x8x!tpu.dma_semaphore, #tpu.memory_space<semaphore_mem>> -> memref<1x1x!tpu.dma_semaphore, #tpu.memory_space<semaphore_mem>>
    %35 = tpu.memref_squeeze %34 : memref<1x1x!tpu.dma_semaphore, #tpu.memory_space<semaphore_mem>> -> memref<!tpu.dma_semaphore, #tpu.memory_space<semaphore_mem>>
    tpu.enqueue_dma source(%31 : memref<1x128xf32, #tpu.memory_space<any>>) target(%33 : memref<1x128xf32, #tpu.memory_space<vmem>>) target_semaphore(%35 : memref<!tpu.dma_semaphore, #tpu.memory_space<semaphore_mem>>)
    %c8_i32_30 = arith.constant 8 : i32
    %36 = arith.muli %arg0, %c8_i32_30 : i32
    %c4_i32 = arith.constant 4 : i32
    %37 = arith.addi %36, %c4_i32 : i32
    %38 = arith.index_cast %37 : i32 to index
    %c0_31 = arith.constant 0 : index
    %39 = memref.load %arg1[%38, %c0_31] : memref<8x10xi32, #tpu.memory_space<smem>>
    %c0_i32_32 = arith.constant 0 : i32
    %c0_i32_33 = arith.constant 0 : i32
    %c4_i32_34 = arith.constant 4 : i32
    %c0_i32_35 = arith.constant 0 : i32
    %40 = tpu.memref_slice %arg2[%39, %c0_i32_35] : memref<256x128xf32, #tpu.memory_space<any>> -> memref<1x128xf32, #tpu.memory_space<any>>
    %c4_i32_36 = arith.constant 4 : i32
    %c0_i32_37 = arith.constant 0 : i32
    %41 = tpu.memref_slice %arg8[%c0_i32_32, %c4_i32_36, %c0_i32_37] : memref<2x8x128xf32, #tpu.memory_space<vmem>> -> memref<1x1x128xf32, #tpu.memory_space<vmem>>
    %42 = tpu.memref_squeeze %41 : memref<1x1x128xf32, #tpu.memory_space<vmem>> -> memref<1x128xf32, #tpu.memory_space<vmem>>
    %43 = tpu.memref_slice %arg10[%c0_i32_33, %c4_i32_34] : memref<2x8x!tpu.dma_semaphore, #tpu.memory_space<semaphore_mem>> -> memref<1x1x!tpu.dma_semaphore, #tpu.memory_space<semaphore_mem>>
    %44 = tpu.memref_squeeze %43 : memref<1x1x!tpu.dma_semaphore, #tpu.memory_space<semaphore_mem>> -> memref<!tpu.dma_semaphore, #tpu.memory_space<semaphore_mem>>
    tpu.enqueue_dma source(%40 : memref<1x128xf32, #tpu.memory_space<any>>) target(%42 : memref<1x128xf32, #tpu.memory_space<vmem>>) target_semaphore(%44 : memref<!tpu.dma_semaphore, #tpu.memory_space<semaphore_mem>>)
    %c8_i32_38 = arith.constant 8 : i32
    %45 = arith.muli %arg0, %c8_i32_38 : i32
    %c5_i32 = arith.constant 5 : i32
    %46 = arith.addi %45, %c5_i32 : i32
    %47 = arith.index_cast %46 : i32 to index
    %c0_39 = arith.constant 0 : index
    %48 = memref.load %arg1[%47, %c0_39] : memref<8x10xi32, #tpu.memory_space<smem>>
    %c0_i32_40 = arith.constant 0 : i32
    %c0_i32_41 = arith.constant 0 : i32
    %c5_i32_42 = arith.constant 5 : i32
    %c0_i32_43 = arith.constant 0 : i32
    %49 = tpu.memref_slice %arg2[%48, %c0_i32_43] : memref<256x128xf32, #tpu.memory_space<any>> -> memref<1x128xf32, #tpu.memory_space<any>>
    %c5_i32_44 = arith.constant 5 : i32
    %c0_i32_45 = arith.constant 0 : i32
    %50 = tpu.memref_slice %arg8[%c0_i32_40, %c5_i32_44, %c0_i32_45] : memref<2x8x128xf32, #tpu.memory_space<vmem>> -> memref<1x1x128xf32, #tpu.memory_space<vmem>>
    %51 = tpu.memref_squeeze %50 : memref<1x1x128xf32, #tpu.memory_space<vmem>> -> memref<1x128xf32, #tpu.memory_space<vmem>>
    %52 = tpu.memref_slice %arg10[%c0_i32_41, %c5_i32_42] : memref<2x8x!tpu.dma_semaphore, #tpu.memory_space<semaphore_mem>> -> memref<1x1x!tpu.dma_semaphore, #tpu.memory_space<semaphore_mem>>
    %53 = tpu.memref_squeeze %52 : memref<1x1x!tpu.dma_semaphore, #tpu.memory_space<semaphore_mem>> -> memref<!tpu.dma_semaphore, #tpu.memory_space<semaphore_mem>>
    tpu.enqueue_dma source(%49 : memref<1x128xf32, #tpu.memory_space<any>>) target(%51 : memref<1x128xf32, #tpu.memory_space<vmem>>) target_semaphore(%53 : memref<!tpu.dma_semaphore, #tpu.memory_space<semaphore_mem>>)
    %c8_i32_46 = arith.constant 8 : i32
    %54 = arith.muli %arg0, %c8_i32_46 : i32
    %c6_i32 = arith.constant 6 : i32
    %55 = arith.addi %54, %c6_i32 : i32
    %56 = arith.index_cast %55 : i32 to index
    %c0_47 = arith.constant 0 : index
    %57 = memref.load %arg1[%56, %c0_47] : memref<8x10xi32, #tpu.memory_space<smem>>
    %c0_i32_48 = arith.constant 0 : i32
    %c0_i32_49 = arith.constant 0 : i32
    %c6_i32_50 = arith.constant 6 : i32
    %c0_i32_51 = arith.constant 0 : i32
    %58 = tpu.memref_slice %arg2[%57, %c0_i32_51] : memref<256x128xf32, #tpu.memory_space<any>> -> memref<1x128xf32, #tpu.memory_space<any>>
    %c6_i32_52 = arith.constant 6 : i32
    %c0_i32_53 = arith.constant 0 : i32
    %59 = tpu.memref_slice %arg8[%c0_i32_48, %c6_i32_52, %c0_i32_53] : memref<2x8x128xf32, #tpu.memory_space<vmem>> -> memref<1x1x128xf32, #tpu.memory_space<vmem>>
    %60 = tpu.memref_squeeze %59 : memref<1x1x128xf32, #tpu.memory_space<vmem>> -> memref<1x128xf32, #tpu.memory_space<vmem>>
    %61 = tpu.memref_slice %arg10[%c0_i32_49, %c6_i32_50] : memref<2x8x!tpu.dma_semaphore, #tpu.memory_space<semaphore_mem>> -> memref<1x1x!tpu.dma_semaphore, #tpu.memory_space<semaphore_mem>>
    %62 = tpu.memref_squeeze %61 : memref<1x1x!tpu.dma_semaphore, #tpu.memory_space<semaphore_mem>> -> memref<!tpu.dma_semaphore, #tpu.memory_space<semaphore_mem>>
    tpu.enqueue_dma source(%58 : memref<1x128xf32, #tpu.memory_space<any>>) target(%60 : memref<1x128xf32, #tpu.memory_space<vmem>>) target_semaphore(%62 : memref<!tpu.dma_semaphore, #tpu.memory_space<semaphore_mem>>)
    %c8_i32_54 = arith.constant 8 : i32
    %63 = arith.muli %arg0, %c8_i32_54 : i32
    %c7_i32 = arith.constant 7 : i32
    %64 = arith.addi %63, %c7_i32 : i32
    %65 = arith.index_cast %64 : i32 to index
    %c0_55 = arith.constant 0 : index
    %66 = memref.load %arg1[%65, %c0_55] : memref<8x10xi32, #tpu.memory_space<smem>>
    %c0_i32_56 = arith.constant 0 : i32
    %c0_i32_57 = arith.constant 0 : i32
    %c7_i32_58 = arith.constant 7 : i32
    %c0_i32_59 = arith.constant 0 : i32
    %67 = tpu.memref_slice %arg2[%66, %c0_i32_59] : memref<256x128xf32, #tpu.memory_space<any>> -> memref<1x128xf32, #tpu.memory_space<any>>
    %c7_i32_60 = arith.constant 7 : i32
    %c0_i32_61 = arith.constant 0 : i32
    %68 = tpu.memref_slice %arg8[%c0_i32_56, %c7_i32_60, %c0_i32_61] : memref<2x8x128xf32, #tpu.memory_space<vmem>> -> memref<1x1x128xf32, #tpu.memory_space<vmem>>
    %69 = tpu.memref_squeeze %68 : memref<1x1x128xf32, #tpu.memory_space<vmem>> -> memref<1x128xf32, #tpu.memory_space<vmem>>
    %70 = tpu.memref_slice %arg10[%c0_i32_57, %c7_i32_58] : memref<2x8x!tpu.dma_semaphore, #tpu.memory_space<semaphore_mem>> -> memref<1x1x!tpu.dma_semaphore, #tpu.memory_space<semaphore_mem>>
    %71 = tpu.memref_squeeze %70 : memref<1x1x!tpu.dma_semaphore, #tpu.memory_space<semaphore_mem>> -> memref<!tpu.dma_semaphore, #tpu.memory_space<semaphore_mem>>
    tpu.enqueue_dma source(%67 : memref<1x128xf32, #tpu.memory_space<any>>) target(%69 : memref<1x128xf32, #tpu.memory_space<vmem>>) target_semaphore(%71 : memref<!tpu.dma_semaphore, #tpu.memory_space<semaphore_mem>>)
    %cst = arith.constant 0.000000e+00 : f32
    %72 = vector.broadcast %cst : f32 to vector<8x128xf32>
    %c0_62 = arith.constant 0 : index
    %c0_63 = arith.constant 0 : index
    %73 = vector.load %arg9[%c0_62, %c0_63] : memref<8x128xf32, #tpu.memory_space<vmem>>, vector<8x128xf32>
    tpu.vector_store %arg9[%c0_62, %c0_63], %72 {strides = array<i32>} : memref<8x128xf32, #tpu.memory_space<vmem>>, vector<8x128xf32>,
    %c0_i32_64 = arith.constant 0 : i32
    %c10_i32 = arith.constant 10 : i32
    %74 = arith.addi %c0_i32_64, %c10_i32 : i32
    %c1_i32_65 = arith.constant 1 : i32
    scf.for %arg11 = %c0_i32_64 to %74 step %c1_i32_65  : i32 {
      %c2_i32_84 = arith.constant 2 : i32
      %c0_i32_85 = arith.constant 0 : i32
      %103 = arith.cmpi eq, %c2_i32_84, %c0_i32_85 : i32
      %c1_i32_86 = arith.constant 1 : i32
      %104 = arith.select %103, %c1_i32_86, %c2_i32_84 : i32
      %105 = arith.remsi %arg11, %104 : i32
      %c0_i32_87 = arith.constant 0 : i32
      %106 = arith.cmpi ne, %105, %c0_i32_87 : i32
      %c0_i32_88 = arith.constant 0 : i32
      %107 = arith.cmpi slt, %105, %c0_i32_88 : i32
      %c0_i32_89 = arith.constant 0 : i32
      %108 = arith.cmpi slt, %104, %c0_i32_89 : i32
      %109 = arith.xori %107, %108 : i1
      %110 = arith.andi %109, %106 : i1
      %111 = arith.addi %105, %104 : i32
      %112 = arith.select %110, %111, %105 : i32
      %c0_i32_90 = arith.constant 0 : i32
      %c0_i32_91 = arith.constant 0 : i32
      %c0_i32_92 = arith.constant 0 : i32
      %113 = tpu.memref_slice %arg2[%c0_i32_91, %c0_i32_92] : memref<256x128xf32, #tpu.memory_space<any>> -> memref<1x128xf32, #tpu.memory_space<any>>
      %c0_i32_93 = arith.constant 0 : i32
      %c0_i32_94 = arith.constant 0 : i32
      %114 = tpu.memref_slice %arg8[%112, %c0_i32_93, %c0_i32_94] : memref<2x8x128xf32, #tpu.memory_space<vmem>> -> memref<1x1x128xf32, #tpu.memory_space<vmem>>
      %115 = tpu.memref_squeeze %114 : memref<1x1x128xf32, #tpu.memory_space<vmem>> -> memref<1x128xf32, #tpu.memory_space<vmem>>
      %116 = tpu.memref_slice %arg10[%112, %c0_i32_90] : memref<2x8x!tpu.dma_semaphore, #tpu.memory_space<semaphore_mem>> -> memref<1x1x!tpu.dma_semaphore, #tpu.memory_space<semaphore_mem>>
      %117 = tpu.memref_squeeze %116 : memref<1x1x!tpu.dma_semaphore, #tpu.memory_space<semaphore_mem>> -> memref<!tpu.dma_semaphore, #tpu.memory_space<semaphore_mem>>
      tpu.wait_dma2 semaphore(%117 : memref<!tpu.dma_semaphore, #tpu.memory_space<semaphore_mem>>) src(%113 : memref<1x128xf32, #tpu.memory_space<any>>) dst(%115 : memref<1x128xf32, #tpu.memory_space<vmem>>)
      %c1_i32_95 = arith.constant 1 : i32
      %c0_i32_96 = arith.constant 0 : i32
      %c0_i32_97 = arith.constant 0 : i32
      %118 = tpu.memref_slice %arg2[%c0_i32_96, %c0_i32_97] : memref<256x128xf32, #tpu.memory_space<any>> -> memref<1x128xf32, #tpu.memory_space<any>>
      %c1_i32_98 = arith.constant 1 : i32
      %c0_i32_99 = arith.constant 0 : i32
      %119 = tpu.memref_slice %arg8[%112, %c1_i32_98, %c0_i32_99] : memref<2x8x128xf32, #tpu.memory_space<vmem>> -> memref<1x1x128xf32, #tpu.memory_space<vmem>>
      %120 = tpu.memref_squeeze %119 : memref<1x1x128xf32, #tpu.memory_space<vmem>> -> memref<1x128xf32, #tpu.memory_space<vmem>>
      %121 = tpu.memref_slice %arg10[%112, %c1_i32_95] : memref<2x8x!tpu.dma_semaphore, #tpu.memory_space<semaphore_mem>> -> memref<1x1x!tpu.dma_semaphore, #tpu.memory_space<semaphore_mem>>
      %122 = tpu.memref_squeeze %121 : memref<1x1x!tpu.dma_semaphore, #tpu.memory_space<semaphore_mem>> -> memref<!tpu.dma_semaphore, #tpu.memory_space<semaphore_mem>>
      tpu.wait_dma2 semaphore(%122 : memref<!tpu.dma_semaphore, #tpu.memory_space<semaphore_mem>>) src(%118 : memref<1x128xf32, #tpu.memory_space<any>>) dst(%120 : memref<1x128xf32, #tpu.memory_space<vmem>>)
      %c2_i32_100 = arith.constant 2 : i32
      %c0_i32_101 = arith.constant 0 : i32
      %c0_i32_102 = arith.constant 0 : i32
      %123 = tpu.memref_slice %arg2[%c0_i32_101, %c0_i32_102] : memref<256x128xf32, #tpu.memory_space<any>> -> memref<1x128xf32, #tpu.memory_space<any>>
      %c2_i32_103 = arith.constant 2 : i32
      %c0_i32_104 = arith.constant 0 : i32
      %124 = tpu.memref_slice %arg8[%112, %c2_i32_103, %c0_i32_104] : memref<2x8x128xf32, #tpu.memory_space<vmem>> -> memref<1x1x128xf32, #tpu.memory_space<vmem>>
      %125 = tpu.memref_squeeze %124 : memref<1x1x128xf32, #tpu.memory_space<vmem>> -> memref<1x128xf32, #tpu.memory_space<vmem>>
      %126 = tpu.memref_slice %arg10[%112, %c2_i32_100] : memref<2x8x!tpu.dma_semaphore, #tpu.memory_space<semaphore_mem>> -> memref<1x1x!tpu.dma_semaphore, #tpu.memory_space<semaphore_mem>>
      %127 = tpu.memref_squeeze %126 : memref<1x1x!tpu.dma_semaphore, #tpu.memory_space<semaphore_mem>> -> memref<!tpu.dma_semaphore, #tpu.memory_space<semaphore_mem>>
      tpu.wait_dma2 semaphore(%127 : memref<!tpu.dma_semaphore, #tpu.memory_space<semaphore_mem>>) src(%123 : memref<1x128xf32, #tpu.memory_space<any>>) dst(%125 : memref<1x128xf32, #tpu.memory_space<vmem>>)
      %c3_i32_105 = arith.constant 3 : i32
      %c0_i32_106 = arith.constant 0 : i32
      %c0_i32_107 = arith.constant 0 : i32
      %128 = tpu.memref_slice %arg2[%c0_i32_106, %c0_i32_107] : memref<256x128xf32, #tpu.memory_space<any>> -> memref<1x128xf32, #tpu.memory_space<any>>
      %c3_i32_108 = arith.constant 3 : i32
      %c0_i32_109 = arith.constant 0 : i32
      %129 = tpu.memref_slice %arg8[%112, %c3_i32_108, %c0_i32_109] : memref<2x8x128xf32, #tpu.memory_space<vmem>> -> memref<1x1x128xf32, #tpu.memory_space<vmem>>
      %130 = tpu.memref_squeeze %129 : memref<1x1x128xf32, #tpu.memory_space<vmem>> -> memref<1x128xf32, #tpu.memory_space<vmem>>
      %131 = tpu.memref_slice %arg10[%112, %c3_i32_105] : memref<2x8x!tpu.dma_semaphore, #tpu.memory_space<semaphore_mem>> -> memref<1x1x!tpu.dma_semaphore, #tpu.memory_space<semaphore_mem>>
      %132 = tpu.memref_squeeze %131 : memref<1x1x!tpu.dma_semaphore, #tpu.memory_space<semaphore_mem>> -> memref<!tpu.dma_semaphore, #tpu.memory_space<semaphore_mem>>
      tpu.wait_dma2 semaphore(%132 : memref<!tpu.dma_semaphore, #tpu.memory_space<semaphore_mem>>) src(%128 : memref<1x128xf32, #tpu.memory_space<any>>) dst(%130 : memref<1x128xf32, #tpu.memory_space<vmem>>)
      %c4_i32_110 = arith.constant 4 : i32
      %c0_i32_111 = arith.constant 0 : i32
      %c0_i32_112 = arith.constant 0 : i32
      %133 = tpu.memref_slice %arg2[%c0_i32_111, %c0_i32_112] : memref<256x128xf32, #tpu.memory_space<any>> -> memref<1x128xf32, #tpu.memory_space<any>>
      %c4_i32_113 = arith.constant 4 : i32
      %c0_i32_114 = arith.constant 0 : i32
      %134 = tpu.memref_slice %arg8[%112, %c4_i32_113, %c0_i32_114] : memref<2x8x128xf32, #tpu.memory_space<vmem>> -> memref<1x1x128xf32, #tpu.memory_space<vmem>>
      %135 = tpu.memref_squeeze %134 : memref<1x1x128xf32, #tpu.memory_space<vmem>> -> memref<1x128xf32, #tpu.memory_space<vmem>>
      %136 = tpu.memref_slice %arg10[%112, %c4_i32_110] : memref<2x8x!tpu.dma_semaphore, #tpu.memory_space<semaphore_mem>> -> memref<1x1x!tpu.dma_semaphore, #tpu.memory_space<semaphore_mem>>
      %137 = tpu.memref_squeeze %136 : memref<1x1x!tpu.dma_semaphore, #tpu.memory_space<semaphore_mem>> -> memref<!tpu.dma_semaphore, #tpu.memory_space<semaphore_mem>>
      tpu.wait_dma2 semaphore(%137 : memref<!tpu.dma_semaphore, #tpu.memory_space<semaphore_mem>>) src(%133 : memref<1x128xf32, #tpu.memory_space<any>>) dst(%135 : memref<1x128xf32, #tpu.memory_space<vmem>>)
      %c5_i32_115 = arith.constant 5 : i32
      %c0_i32_116 = arith.constant 0 : i32
      %c0_i32_117 = arith.constant 0 : i32
      %138 = tpu.memref_slice %arg2[%c0_i32_116, %c0_i32_117] : memref<256x128xf32, #tpu.memory_space<any>> -> memref<1x128xf32, #tpu.memory_space<any>>
      %c5_i32_118 = arith.constant 5 : i32
      %c0_i32_119 = arith.constant 0 : i32
      %139 = tpu.memref_slice %arg8[%112, %c5_i32_118, %c0_i32_119] : memref<2x8x128xf32, #tpu.memory_space<vmem>> -> memref<1x1x128xf32, #tpu.memory_space<vmem>>
      %140 = tpu.memref_squeeze %139 : memref<1x1x128xf32, #tpu.memory_space<vmem>> -> memref<1x128xf32, #tpu.memory_space<vmem>>
      %141 = tpu.memref_slice %arg10[%112, %c5_i32_115] : memref<2x8x!tpu.dma_semaphore, #tpu.memory_space<semaphore_mem>> -> memref<1x1x!tpu.dma_semaphore, #tpu.memory_space<semaphore_mem>>
      %142 = tpu.memref_squeeze %141 : memref<1x1x!tpu.dma_semaphore, #tpu.memory_space<semaphore_mem>> -> memref<!tpu.dma_semaphore, #tpu.memory_space<semaphore_mem>>
      tpu.wait_dma2 semaphore(%142 : memref<!tpu.dma_semaphore, #tpu.memory_space<semaphore_mem>>) src(%138 : memref<1x128xf32, #tpu.memory_space<any>>) dst(%140 : memref<1x128xf32, #tpu.memory_space<vmem>>)
      %c6_i32_120 = arith.constant 6 : i32
      %c0_i32_121 = arith.constant 0 : i32
      %c0_i32_122 = arith.constant 0 : i32
      %143 = tpu.memref_slice %arg2[%c0_i32_121, %c0_i32_122] : memref<256x128xf32, #tpu.memory_space<any>> -> memref<1x128xf32, #tpu.memory_space<any>>
      %c6_i32_123 = arith.constant 6 : i32
      %c0_i32_124 = arith.constant 0 : i32
      %144 = tpu.memref_slice %arg8[%112, %c6_i32_123, %c0_i32_124] : memref<2x8x128xf32, #tpu.memory_space<vmem>> -> memref<1x1x128xf32, #tpu.memory_space<vmem>>
      %145 = tpu.memref_squeeze %144 : memref<1x1x128xf32, #tpu.memory_space<vmem>> -> memref<1x128xf32, #tpu.memory_space<vmem>>
      %146 = tpu.memref_slice %arg10[%112, %c6_i32_120] : memref<2x8x!tpu.dma_semaphore, #tpu.memory_space<semaphore_mem>> -> memref<1x1x!tpu.dma_semaphore, #tpu.memory_space<semaphore_mem>>
      %147 = tpu.memref_squeeze %146 : memref<1x1x!tpu.dma_semaphore, #tpu.memory_space<semaphore_mem>> -> memref<!tpu.dma_semaphore, #tpu.memory_space<semaphore_mem>>
      tpu.wait_dma2 semaphore(%147 : memref<!tpu.dma_semaphore, #tpu.memory_space<semaphore_mem>>) src(%143 : memref<1x128xf32, #tpu.memory_space<any>>) dst(%145 : memref<1x128xf32, #tpu.memory_space<vmem>>)
      %c7_i32_125 = arith.constant 7 : i32
      %c0_i32_126 = arith.constant 0 : i32
      %c0_i32_127 = arith.constant 0 : i32
      %148 = tpu.memref_slice %arg2[%c0_i32_126, %c0_i32_127] : memref<256x128xf32, #tpu.memory_space<any>> -> memref<1x128xf32, #tpu.memory_space<any>>
      %c7_i32_128 = arith.constant 7 : i32
      %c0_i32_129 = arith.constant 0 : i32
      %149 = tpu.memref_slice %arg8[%112, %c7_i32_128, %c0_i32_129] : memref<2x8x128xf32, #tpu.memory_space<vmem>> -> memref<1x1x128xf32, #tpu.memory_space<vmem>>
      %150 = tpu.memref_squeeze %149 : memref<1x1x128xf32, #tpu.memory_space<vmem>> -> memref<1x128xf32, #tpu.memory_space<vmem>>
      %151 = tpu.memref_slice %arg10[%112, %c7_i32_125] : memref<2x8x!tpu.dma_semaphore, #tpu.memory_space<semaphore_mem>> -> memref<1x1x!tpu.dma_semaphore, #tpu.memory_space<semaphore_mem>>
      %152 = tpu.memref_squeeze %151 : memref<1x1x!tpu.dma_semaphore, #tpu.memory_space<semaphore_mem>> -> memref<!tpu.dma_semaphore, #tpu.memory_space<semaphore_mem>>
      tpu.wait_dma2 semaphore(%152 : memref<!tpu.dma_semaphore, #tpu.memory_space<semaphore_mem>>) src(%148 : memref<1x128xf32, #tpu.memory_space<any>>) dst(%150 : memref<1x128xf32, #tpu.memory_space<vmem>>)
      %c1_i32_130 = arith.constant 1 : i32
      %153 = arith.addi %arg11, %c1_i32_130 : i32
      %c10_i32_131 = arith.constant 10 : i32
      %154 = arith.cmpi slt, %153, %c10_i32_131 : i32
      %155 = arith.extui %154 : i1 to i32
      %c0_i32_132 = arith.constant 0 : i32
      %156 = arith.cmpi ne, %155, %c0_i32_132 : i32
      scf.if %156 {
        %c1_i32_139 = arith.constant 1 : i32
        %163 = arith.addi %arg11, %c1_i32_139 : i32
        %c1_i32_140 = arith.constant 1 : i32
        %164 = arith.subi %c1_i32_140, %112 : i32
        %c8_i32_141 = arith.constant 8 : i32
        %165 = arith.muli %arg0, %c8_i32_141 : i32
        %c0_i32_142 = arith.constant 0 : i32
        %166 = arith.addi %165, %c0_i32_142 : i32
        %167 = arith.index_cast %166 : i32 to index
        %168 = arith.index_cast %163 : i32 to index
        %169 = memref.load %arg1[%167, %168] : memref<8x10xi32, #tpu.memory_space<smem>>
        %c0_i32_143 = arith.constant 0 : i32
        %c0_i32_144 = arith.constant 0 : i32
        %170 = tpu.memref_slice %arg2[%169, %c0_i32_144] : memref<256x128xf32, #tpu.memory_space<any>> -> memref<1x128xf32, #tpu.memory_space<any>>
        %c0_i32_145 = arith.constant 0 : i32
        %c0_i32_146 = arith.constant 0 : i32
        %171 = tpu.memref_slice %arg8[%164, %c0_i32_145, %c0_i32_146] : memref<2x8x128xf32, #tpu.memory_space<vmem>> -> memref<1x1x128xf32, #tpu.memory_space<vmem>>
        %172 = tpu.memref_squeeze %171 : memref<1x1x128xf32, #tpu.memory_space<vmem>> -> memref<1x128xf32, #tpu.memory_space<vmem>>
        %173 = tpu.memref_slice %arg10[%164, %c0_i32_143] : memref<2x8x!tpu.dma_semaphore, #tpu.memory_space<semaphore_mem>> -> memref<1x1x!tpu.dma_semaphore, #tpu.memory_space<semaphore_mem>>
        %174 = tpu.memref_squeeze %173 : memref<1x1x!tpu.dma_semaphore, #tpu.memory_space<semaphore_mem>> -> memref<!tpu.dma_semaphore, #tpu.memory_space<semaphore_mem>>
        tpu.enqueue_dma source(%170 : memref<1x128xf32, #tpu.memory_space<any>>) target(%172 : memref<1x128xf32, #tpu.memory_space<vmem>>) target_semaphore(%174 : memref<!tpu.dma_semaphore, #tpu.memory_space<semaphore_mem>>)
        %c8_i32_147 = arith.constant 8 : i32
        %175 = arith.muli %arg0, %c8_i32_147 : i32
        %c1_i32_148 = arith.constant 1 : i32
        %176 = arith.addi %175, %c1_i32_148 : i32
        %177 = arith.index_cast %176 : i32 to index
        %178 = arith.index_cast %163 : i32 to index
        %179 = memref.load %arg1[%177, %178] : memref<8x10xi32, #tpu.memory_space<smem>>
        %c1_i32_149 = arith.constant 1 : i32
        %c0_i32_150 = arith.constant 0 : i32
        %180 = tpu.memref_slice %arg2[%179, %c0_i32_150] : memref<256x128xf32, #tpu.memory_space<any>> -> memref<1x128xf32, #tpu.memory_space<any>>
        %c1_i32_151 = arith.constant 1 : i32
        %c0_i32_152 = arith.constant 0 : i32
        %181 = tpu.memref_slice %arg8[%164, %c1_i32_151, %c0_i32_152] : memref<2x8x128xf32, #tpu.memory_space<vmem>> -> memref<1x1x128xf32, #tpu.memory_space<vmem>>
        %182 = tpu.memref_squeeze %181 : memref<1x1x128xf32, #tpu.memory_space<vmem>> -> memref<1x128xf32, #tpu.memory_space<vmem>>
        %183 = tpu.memref_slice %arg10[%164, %c1_i32_149] : memref<2x8x!tpu.dma_semaphore, #tpu.memory_space<semaphore_mem>> -> memref<1x1x!tpu.dma_semaphore, #tpu.memory_space<semaphore_mem>>
        %184 = tpu.memref_squeeze %183 : memref<1x1x!tpu.dma_semaphore, #tpu.memory_space<semaphore_mem>> -> memref<!tpu.dma_semaphore, #tpu.memory_space<semaphore_mem>>
        tpu.enqueue_dma source(%180 : memref<1x128xf32, #tpu.memory_space<any>>) target(%182 : memref<1x128xf32, #tpu.memory_space<vmem>>) target_semaphore(%184 : memref<!tpu.dma_semaphore, #tpu.memory_space<semaphore_mem>>)
        %c8_i32_153 = arith.constant 8 : i32
        %185 = arith.muli %arg0, %c8_i32_153 : i32
        %c2_i32_154 = arith.constant 2 : i32
        %186 = arith.addi %185, %c2_i32_154 : i32
        %187 = arith.index_cast %186 : i32 to index
        %188 = arith.index_cast %163 : i32 to index
        %189 = memref.load %arg1[%187, %188] : memref<8x10xi32, #tpu.memory_space<smem>>
        %c2_i32_155 = arith.constant 2 : i32
        %c0_i32_156 = arith.constant 0 : i32
        %190 = tpu.memref_slice %arg2[%189, %c0_i32_156] : memref<256x128xf32, #tpu.memory_space<any>> -> memref<1x128xf32, #tpu.memory_space<any>>
        %c2_i32_157 = arith.constant 2 : i32
        %c0_i32_158 = arith.constant 0 : i32
        %191 = tpu.memref_slice %arg8[%164, %c2_i32_157, %c0_i32_158] : memref<2x8x128xf32, #tpu.memory_space<vmem>> -> memref<1x1x128xf32, #tpu.memory_space<vmem>>
        %192 = tpu.memref_squeeze %191 : memref<1x1x128xf32, #tpu.memory_space<vmem>> -> memref<1x128xf32, #tpu.memory_space<vmem>>
        %193 = tpu.memref_slice %arg10[%164, %c2_i32_155] : memref<2x8x!tpu.dma_semaphore, #tpu.memory_space<semaphore_mem>> -> memref<1x1x!tpu.dma_semaphore, #tpu.memory_space<semaphore_mem>>
        %194 = tpu.memref_squeeze %193 : memref<1x1x!tpu.dma_semaphore, #tpu.memory_space<semaphore_mem>> -> memref<!tpu.dma_semaphore, #tpu.memory_space<semaphore_mem>>
        tpu.enqueue_dma source(%190 : memref<1x128xf32, #tpu.memory_space<any>>) target(%192 : memref<1x128xf32, #tpu.memory_space<vmem>>) target_semaphore(%194 : memref<!tpu.dma_semaphore, #tpu.memory_space<semaphore_mem>>)
        %c8_i32_159 = arith.constant 8 : i32
        %195 = arith.muli %arg0, %c8_i32_159 : i32
        %c3_i32_160 = arith.constant 3 : i32
        %196 = arith.addi %195, %c3_i32_160 : i32
        %197 = arith.index_cast %196 : i32 to index
        %198 = arith.index_cast %163 : i32 to index
        %199 = memref.load %arg1[%197, %198] : memref<8x10xi32, #tpu.memory_space<smem>>
        %c3_i32_161 = arith.constant 3 : i32
        %c0_i32_162 = arith.constant 0 : i32
        %200 = tpu.memref_slice %arg2[%199, %c0_i32_162] : memref<256x128xf32, #tpu.memory_space<any>> -> memref<1x128xf32, #tpu.memory_space<any>>
        %c3_i32_163 = arith.constant 3 : i32
        %c0_i32_164 = arith.constant 0 : i32
        %201 = tpu.memref_slice %arg8[%164, %c3_i32_163, %c0_i32_164] : memref<2x8x128xf32, #tpu.memory_space<vmem>> -> memref<1x1x128xf32, #tpu.memory_space<vmem>>
        %202 = tpu.memref_squeeze %201 : memref<1x1x128xf32, #tpu.memory_space<vmem>> -> memref<1x128xf32, #tpu.memory_space<vmem>>
        %203 = tpu.memref_slice %arg10[%164, %c3_i32_161] : memref<2x8x!tpu.dma_semaphore, #tpu.memory_space<semaphore_mem>> -> memref<1x1x!tpu.dma_semaphore, #tpu.memory_space<semaphore_mem>>
        %204 = tpu.memref_squeeze %203 : memref<1x1x!tpu.dma_semaphore, #tpu.memory_space<semaphore_mem>> -> memref<!tpu.dma_semaphore, #tpu.memory_space<semaphore_mem>>
        tpu.enqueue_dma source(%200 : memref<1x128xf32, #tpu.memory_space<any>>) target(%202 : memref<1x128xf32, #tpu.memory_space<vmem>>) target_semaphore(%204 : memref<!tpu.dma_semaphore, #tpu.memory_space<semaphore_mem>>)
        %c8_i32_165 = arith.constant 8 : i32
        %205 = arith.muli %arg0, %c8_i32_165 : i32
        %c4_i32_166 = arith.constant 4 : i32
        %206 = arith.addi %205, %c4_i32_166 : i32
        %207 = arith.index_cast %206 : i32 to index
        %208 = arith.index_cast %163 : i32 to index
        %209 = memref.load %arg1[%207, %208] : memref<8x10xi32, #tpu.memory_space<smem>>
        %c4_i32_167 = arith.constant 4 : i32
        %c0_i32_168 = arith.constant 0 : i32
        %210 = tpu.memref_slice %arg2[%209, %c0_i32_168] : memref<256x128xf32, #tpu.memory_space<any>> -> memref<1x128xf32, #tpu.memory_space<any>>
        %c4_i32_169 = arith.constant 4 : i32
        %c0_i32_170 = arith.constant 0 : i32
        %211 = tpu.memref_slice %arg8[%164, %c4_i32_169, %c0_i32_170] : memref<2x8x128xf32, #tpu.memory_space<vmem>> -> memref<1x1x128xf32, #tpu.memory_space<vmem>>
        %212 = tpu.memref_squeeze %211 : memref<1x1x128xf32, #tpu.memory_space<vmem>> -> memref<1x128xf32, #tpu.memory_space<vmem>>
        %213 = tpu.memref_slice %arg10[%164, %c4_i32_167] : memref<2x8x!tpu.dma_semaphore, #tpu.memory_space<semaphore_mem>> -> memref<1x1x!tpu.dma_semaphore, #tpu.memory_space<semaphore_mem>>
        %214 = tpu.memref_squeeze %213 : memref<1x1x!tpu.dma_semaphore, #tpu.memory_space<semaphore_mem>> -> memref<!tpu.dma_semaphore, #tpu.memory_space<semaphore_mem>>
        tpu.enqueue_dma source(%210 : memref<1x128xf32, #tpu.memory_space<any>>) target(%212 : memref<1x128xf32, #tpu.memory_space<vmem>>) target_semaphore(%214 : memref<!tpu.dma_semaphore, #tpu.memory_space<semaphore_mem>>)
        %c8_i32_171 = arith.constant 8 : i32
        %215 = arith.muli %arg0, %c8_i32_171 : i32
        %c5_i32_172 = arith.constant 5 : i32
        %216 = arith.addi %215, %c5_i32_172 : i32
        %217 = arith.index_cast %216 : i32 to index
        %218 = arith.index_cast %163 : i32 to index
        %219 = memref.load %arg1[%217, %218] : memref<8x10xi32, #tpu.memory_space<smem>>
        %c5_i32_173 = arith.constant 5 : i32
        %c0_i32_174 = arith.constant 0 : i32
        %220 = tpu.memref_slice %arg2[%219, %c0_i32_174] : memref<256x128xf32, #tpu.memory_space<any>> -> memref<1x128xf32, #tpu.memory_space<any>>
        %c5_i32_175 = arith.constant 5 : i32
        %c0_i32_176 = arith.constant 0 : i32
        %221 = tpu.memref_slice %arg8[%164, %c5_i32_175, %c0_i32_176] : memref<2x8x128xf32, #tpu.memory_space<vmem>> -> memref<1x1x128xf32, #tpu.memory_space<vmem>>
        %222 = tpu.memref_squeeze %221 : memref<1x1x128xf32, #tpu.memory_space<vmem>> -> memref<1x128xf32, #tpu.memory_space<vmem>>
        %223 = tpu.memref_slice %arg10[%164, %c5_i32_173] : memref<2x8x!tpu.dma_semaphore, #tpu.memory_space<semaphore_mem>> -> memref<1x1x!tpu.dma_semaphore, #tpu.memory_space<semaphore_mem>>
        %224 = tpu.memref_squeeze %223 : memref<1x1x!tpu.dma_semaphore, #tpu.memory_space<semaphore_mem>> -> memref<!tpu.dma_semaphore, #tpu.memory_space<semaphore_mem>>
        tpu.enqueue_dma source(%220 : memref<1x128xf32, #tpu.memory_space<any>>) target(%222 : memref<1x128xf32, #tpu.memory_space<vmem>>) target_semaphore(%224 : memref<!tpu.dma_semaphore, #tpu.memory_space<semaphore_mem>>)
        %c8_i32_177 = arith.constant 8 : i32
        %225 = arith.muli %arg0, %c8_i32_177 : i32
        %c6_i32_178 = arith.constant 6 : i32
        %226 = arith.addi %225, %c6_i32_178 : i32
        %227 = arith.index_cast %226 : i32 to index
        %228 = arith.index_cast %163 : i32 to index
        %229 = memref.load %arg1[%227, %228] : memref<8x10xi32, #tpu.memory_space<smem>>
        %c6_i32_179 = arith.constant 6 : i32
        %c0_i32_180 = arith.constant 0 : i32
        %230 = tpu.memref_slice %arg2[%229, %c0_i32_180] : memref<256x128xf32, #tpu.memory_space<any>> -> memref<1x128xf32, #tpu.memory_space<any>>
        %c6_i32_181 = arith.constant 6 : i32
        %c0_i32_182 = arith.constant 0 : i32
        %231 = tpu.memref_slice %arg8[%164, %c6_i32_181, %c0_i32_182] : memref<2x8x128xf32, #tpu.memory_space<vmem>> -> memref<1x1x128xf32, #tpu.memory_space<vmem>>
        %232 = tpu.memref_squeeze %231 : memref<1x1x128xf32, #tpu.memory_space<vmem>> -> memref<1x128xf32, #tpu.memory_space<vmem>>
        %233 = tpu.memref_slice %arg10[%164, %c6_i32_179] : memref<2x8x!tpu.dma_semaphore, #tpu.memory_space<semaphore_mem>> -> memref<1x1x!tpu.dma_semaphore, #tpu.memory_space<semaphore_mem>>
        %234 = tpu.memref_squeeze %233 : memref<1x1x!tpu.dma_semaphore, #tpu.memory_space<semaphore_mem>> -> memref<!tpu.dma_semaphore, #tpu.memory_space<semaphore_mem>>
        tpu.enqueue_dma source(%230 : memref<1x128xf32, #tpu.memory_space<any>>) target(%232 : memref<1x128xf32, #tpu.memory_space<vmem>>) target_semaphore(%234 : memref<!tpu.dma_semaphore, #tpu.memory_space<semaphore_mem>>)
        %c8_i32_183 = arith.constant 8 : i32
        %235 = arith.muli %arg0, %c8_i32_183 : i32
        %c7_i32_184 = arith.constant 7 : i32
        %236 = arith.addi %235, %c7_i32_184 : i32
        %237 = arith.index_cast %236 : i32 to index
        %238 = arith.index_cast %163 : i32 to index
        %239 = memref.load %arg1[%237, %238] : memref<8x10xi32, #tpu.memory_space<smem>>
        %c7_i32_185 = arith.constant 7 : i32
        %c0_i32_186 = arith.constant 0 : i32
        %240 = tpu.memref_slice %arg2[%239, %c0_i32_186] : memref<256x128xf32, #tpu.memory_space<any>> -> memref<1x128xf32, #tpu.memory_space<any>>
        %c7_i32_187 = arith.constant 7 : i32
        %c0_i32_188 = arith.constant 0 : i32
        %241 = tpu.memref_slice %arg8[%164, %c7_i32_187, %c0_i32_188] : memref<2x8x128xf32, #tpu.memory_space<vmem>> -> memref<1x1x128xf32, #tpu.memory_space<vmem>>
        %242 = tpu.memref_squeeze %241 : memref<1x1x128xf32, #tpu.memory_space<vmem>> -> memref<1x128xf32, #tpu.memory_space<vmem>>
        %243 = tpu.memref_slice %arg10[%164, %c7_i32_185] : memref<2x8x!tpu.dma_semaphore, #tpu.memory_space<semaphore_mem>> -> memref<1x1x!tpu.dma_semaphore, #tpu.memory_space<semaphore_mem>>
        %244 = tpu.memref_squeeze %243 : memref<1x1x!tpu.dma_semaphore, #tpu.memory_space<semaphore_mem>> -> memref<!tpu.dma_semaphore, #tpu.memory_space<semaphore_mem>>
        tpu.enqueue_dma source(%240 : memref<1x128xf32, #tpu.memory_space<any>>) target(%242 : memref<1x128xf32, #tpu.memory_space<vmem>>) target_semaphore(%244 : memref<!tpu.dma_semaphore, #tpu.memory_space<semaphore_mem>>)
      } else {
      }
      %157 = arith.index_cast %112 : i32 to index
      %c0_133 = arith.constant 0 : index
      %c0_134 = arith.constant 0 : index
      %158 = vector.load %arg8[%157, %c0_133, %c0_134] : memref<2x8x128xf32, #tpu.memory_space<vmem>>, vector<1x8x128xf32>
      %159 = vector.shape_cast %158 : vector<1x8x128xf32> to vector<8x128xf32>
      %c0_135 = arith.constant 0 : index
      %c0_136 = arith.constant 0 : index
      %160 = vector.load %arg9[%c0_135, %c0_136] : memref<8x128xf32, #tpu.memory_space<vmem>>, vector<8x128xf32>
      %161 = arith.addf %160, %159 : vector<8x128xf32>
      %c0_137 = arith.constant 0 : index
      %c0_138 = arith.constant 0 : index
      %162 = vector.load %arg9[%c0_137, %c0_138] : memref<8x128xf32, #tpu.memory_space<vmem>>, vector<8x128xf32>
      tpu.vector_store %arg9[%c0_137, %c0_138], %161 {strides = array<i32>} : memref<8x128xf32, #tpu.memory_space<vmem>>, vector<8x128xf32>,
    }
    %c10_i32_66 = arith.constant 10 : i32
    %c0_67 = arith.constant 0 : index
    %c0_68 = arith.constant 0 : index
    %75 = vector.load %arg9[%c0_67, %c0_68] : memref<8x128xf32, #tpu.memory_space<vmem>>, vector<8x128xf32>
    %cst_69 = arith.constant 1.000000e-01 : f32
    %76 = vector.broadcast %cst_69 : f32 to vector<8x128xf32>
    %77 = arith.mulf %75, %76 : vector<8x128xf32>
    %78 = arith.truncf %77 : vector<8x128xf32> to vector<8x128xbf16>
    %c0_70 = arith.constant 0 : index
    %c0_71 = arith.constant 0 : index
    %79 = vector.load %arg3[%c0_70, %c0_71] : memref<128x128xbf16, #tpu.memory_space<vmem>>, vector<128x128xbf16>
    %cst_72 = arith.constant dense<0.000000e+00> : vector<8x128xf32>
    %80 = tpu.matmul %78, %79, %cst_72 {dimension_numbers = #tpu.dot_dimension_numbers<[1], [0], [0], [1], [0, 0, 1, 1], [], []>} : vector<8x128xbf16>, vector<128x128xbf16>, vector<8x128xf32> -> vector<8x128xf32>
    %c0_73 = arith.constant 0 : index
    %c0_74 = arith.constant 0 : index
    %81 = vector.load %arg4[%c0_73, %c0_74] : memref<1x128xf32, #tpu.memory_space<vmem>>, vector<1x128xf32>
    %82 = vector.broadcast %81 : vector<1x128xf32> to vector<8x128xf32>
    %83 = arith.addf %80, %82 : vector<8x128xf32>
    %cst_75 = arith.constant 0.000000e+00 : f32
    %84 = vector.broadcast %cst_75 : f32 to vector<8x128xf32>
    %85 = arith.maximumf %83, %84 : vector<8x128xf32>
    %c0_76 = arith.constant 0 : index
    %c0_77 = arith.constant 0 : index
    %86 = vector.load %arg5[%c0_76, %c0_77] : memref<1x128xf32, #tpu.memory_space<vmem>>, vector<1x128xf32>
    %87 = vector.broadcast %86 : vector<1x128xf32> to vector<8x128xf32>
    %88 = arith.mulf %85, %87 : vector<8x128xf32>
    %cst_78 = arith.constant dense<0.000000e+00> : vector<8xf32>
    %89 = vector.multi_reduction <add>, %88, %cst_78 [1] : vector<8x128xf32> to vector<8xf32>
    %90 = vector.shape_cast %89 : vector<8xf32> to vector<8x1xf32>
    %c0_79 = arith.constant 0 : index
    %91 = memref.load %arg6[%c0_79] : memref<1xf32, #tpu.memory_space<smem>>
    %92 = vector.broadcast %91 : f32 to vector<8x1xf32>
    %93 = arith.addf %90, %92 : vector<8x1xf32>
    %cst_80 = arith.constant 0.000000e+00 : f32
    %94 = vector.broadcast %cst_80 : f32 to vector<8x1xf32>
    %95 = arith.minimumf %93, %94 : vector<8x1xf32>
    %96 = math.absf %93 : vector<8x1xf32>
    %cst_81 = arith.constant 0.000000e+00 : f32
    %97 = vector.broadcast %cst_81 : f32 to vector<8x1xf32>
    %98 = arith.subf %97, %96 : vector<8x1xf32>
    %99 = math.exp %98 : vector<8x1xf32>
    %100 = math.log1p %99 : vector<8x1xf32>
    %101 = arith.subf %95, %100 : vector<8x1xf32>
    %c0_82 = arith.constant 0 : index
    %c0_83 = arith.constant 0 : index
    %102 = vector.load %arg7[%c0_82, %c0_83] : memref<8x1xf32, #tpu.memory_space<vmem>>, vector<8x1xf32>
    tpu.vector_store %arg7[%c0_82, %c0_83], %101 {strides = array<i32>} : memref<8x1xf32, #tpu.memory_space<vmem>>, vector<8x1xf32>,
    return
  }
  func.func @transform_1(%arg0: i32, %arg1: memref<8x10xi32, #tpu.memory_space<smem>>) -> (i32, i32) {
    %c0_i32 = arith.constant 0 : i32
    %c0_i32_0 = arith.constant 0 : i32
    %c0_i32_1 = arith.constant 0 : i32
    return %c0_i32, %c0_i32_0 : i32, i32
  }
  func.func @transform_2(%arg0: i32, %arg1: memref<8x10xi32, #tpu.memory_space<smem>>) -> (i32, i32) {
    %c0_i32 = arith.constant 0 : i32
    %c0_i32_0 = arith.constant 0 : i32
    %c0_i32_1 = arith.constant 0 : i32
    return %c0_i32, %c0_i32_0 : i32, i32
  }
  func.func @transform_3(%arg0: i32, %arg1: memref<8x10xi32, #tpu.memory_space<smem>>) -> (i32, i32) {
    %c0_i32 = arith.constant 0 : i32
    %c0_i32_0 = arith.constant 0 : i32
    %c0_i32_1 = arith.constant 0 : i32
    return %c0_i32, %c0_i32_0 : i32, i32
  }
  func.func @transform_4(%arg0: i32, %arg1: memref<8x10xi32, #tpu.memory_space<smem>>) -> i32 {
    %c0_i32 = arith.constant 0 : i32
    %c0_i32_0 = arith.constant 0 : i32
    return %c0_i32 : i32
  }
  func.func @transform_5(%arg0: i32, %arg1: memref<8x10xi32, #tpu.memory_space<smem>>) -> (i32, i32) {
    %c0_i32 = arith.constant 0 : i32
    %c0_i32_0 = arith.constant 0 : i32
    return %arg0, %c0_i32 : i32, i32
  }
}

</mosaic_0001>

<bundles_post_ra>
// kernel: tpu_custom_call.1
= control target key start
LH: loop header
LB: loop body
LE: loop exit
PB: predicated region body
PF: predicated region fallthrough
CT: control target
= control target key end

     0   :  { %s1394_s26 = smov [#allocation6]   ;;  %s1852_s0 = inlined_call_operand.hbm [shape: s32[8,10], index: 0, kind: input, shape index: {}]   ;;  %s1853_s1 = inlined_call_operand.hbm [shape: f32[256,128], index: 1, kind: input, shape index: {}]   ;;  %s1854_s2 = inlined_call_operand.hbm [shape: bf16[128,128], index: 2, kind: input, shape index: {}]   ;;  %s1855_s3 = inlined_call_operand.vmem [shape: f32[1,128], index: 3, kind: input, shape index: {}]   ;;  %s1856_s4 = inlined_call_operand.vmem [shape: f32[1,128], index: 4, kind: input, shape index: {}]   ;;  %s1857_s5 = inlined_call_operand.<no memory space> [shape: f32[1], index: 5, kind: input, shape index: {}]   ;;  %s1858_s6 = inlined_call_operand.vmem [shape: f32[8,1], index: 6, kind: output, shape index: {}]  }
   0x1   :  { %s12_s23 = sshll.u32 %s1852_s0, 4  ;;  %16 = sst [smem:[#allocation7]] %s1857_s5  ;;  %s13_s23 = int_to_ptr.hbm [resolvable:$true] %s12_s23 }
   0x2   :  { %15 = dma.hbm_to_smem %s13_s23, 128, %s1394_s26, [#allocation5] }
   0x3   :  { %1370 = dma.done.wait [#allocation5], 128 }
   0x4   :  { %1371 = vsyncadd [#allocation5], 4294967168 }
   0x5   :  { %19 = sfence }
   0x6   :  { %20 = vsyncpa [#allocation9], 0  ;;  %s25_s29 = sshll.u32 %s1854_s2, 4  ;;  %s1395_s30 = smov [#allocation8]   ;;  %s26_s29 = int_to_ptr.hbm [resolvable:$true] %s25_s29 }
   0x7   :  { %s27_s7 = sshll.u32 %s1395_s30, 4  ;;  %s1396_s0 = smov 64   ;;  %s28_s7 = int_to_ptr.vmem [resolvable:$true] %s27_s7 }
   0x8   :  { %s1397_s8 = smov 4  }
   0x9   :  { %33 = dma.hbm_to_vmem [thread:$0]  %s26_s29, 1024, %s28_s7, [#allocation9], %s1396_s0, %s1396_s0, %s1397_s8  }
   0xa   :  { %1372 = dma.done.wait [#allocation9], 1024  }
   0xb   :  { %1373 = vsyncadd [#allocation9], 4294966272  ;;  %s46_s5 = sld [smem:[#allocation6]]  ;;  %s1398_s9 = smov [#allocation2]   ;;  %v1400_v0 = vmov 0.0  }
   0xc   :  { %s1452_s10 = sshll.u32 %s1398_s9, 4  ;;  %s749_s11 = sld [smem:[#allocation6 + $0x80]]  ;;  %194 = vst [vmem:[#allocation3] sm:$0xff] %v1400_v0  ;;  %s58_s10 = int_to_ptr.vmem [resolvable:$true] %s1452_s10 }
   0xd   :  { %s1399_s12 = smov [#allocation2 + $0x1]   ;;  %s1457_s2 = sld [smem:[#allocation6 + $0x100]] }
   0xe   :  { %s1455_s13 = sshll.u32 %s1399_s12, 4  ;;  %s1401_s14 = smov [#allocation2 + $0x2]   ;;  %s77_s13 = int_to_ptr.vmem [resolvable:$true] %s1455_s13 }
   0xf   :  { %s1460_s15 = sshll.u32 %s1401_s14, 4  ;;  %s1462_s16 = sld [smem:[#allocation6 + $0x180]]  ;;  %s96_s15 = int_to_ptr.vmem [resolvable:$true] %s1460_s15 }
  0x10   :  { %s1402_s20 = smov [#allocation2 + $0x3]   ;;  %s1476_s7 = scalar_lea.hbm %s1853_s1, 256 }
  0x11   :  { %s47_s19 = scalar_lea.hbm %s1853_s1, %s46_s5  ;;  %s1468_s21 = sshll.u32 %s1402_s20, 4  ;;  %s115_s21 = int_to_ptr.vmem [resolvable:$true] %s1468_s21 }
  0x12   :  { %s55_s22 = sshll.u32 %s47_s19, 4  ;;  %s64_s25 = scalar_lea.hbm %s1853_s1, %s749_s11  ;;  %s56_s22 = int_to_ptr.hbm [resolvable:$true] %s55_s22 }
  0x13   :  { %s74_s26 = sshll.u32 %s64_s25, 4  ;;  %s950_s27 = sshra.s32 %s56_s22, 4  ;;  %s951_s27 = int_to_ptr.hbm [resolvable:$true] %s950_s27  ;;  %s75_s26 = int_to_ptr.hbm [resolvable:$true] %s74_s26 }
  0x14   :  { %s952_s28 = scalar_lea.hbm %s951_s27, 1  ;;  %p955_p1 = scmp.lt.s32.totalorder %s951_s27, %s1853_s1 }
  0x15   :  { %p953_p0 = scmp.ne.s32.totalorder %s951_s27, %s952_s28  ;;  %p956_p2 = scmp.lt.s32.totalorder %s1476_s7, %s952_s28 }
  0x17   :  { %p957_p3 = por %p956_p2, %p955_p1 }
  0x19   :  { %p958_p4 = pnand %p957_p3, %p953_p0 }
  0x1b   :  { %961 = shalt.err (!%p958_p4)  }
  0x1c   :  { %60 = dma.hbm_to_vmem [thread:$0]  %s56_s22, 16, %s58_s10, [#allocation4] }
  0x1d   :  { %s83_s11 = scalar_lea.hbm %s1853_s1, %s1457_s2  ;;  %s974_s12 = sshra.s32 %s75_s26, 4  ;;  %s975_s12 = int_to_ptr.hbm [resolvable:$true] %s974_s12 }
  0x1e   :  { %s976_s14 = scalar_lea.hbm %s975_s12, 1  ;;  %p979_p6 = scmp.lt.s32.totalorder %s975_s12, %s1853_s1 }
  0x1f   :  { %p977_p5 = scmp.ne.s32.totalorder %s975_s12, %s976_s14  ;;  %p980_p7 = scmp.lt.s32.totalorder %s1476_s7, %s976_s14 }
  0x21   :  { %p981_p8 = por %p980_p7, %p979_p6 }
  0x23   :  { %p982_p9 = pnand %p981_p8, %p977_p5 }
  0x25   :  { %985 = shalt.err (!%p982_p9)  }
  0x26   :  { %79 = dma.hbm_to_vmem [thread:$0]  %s75_s26, 16, %s77_s13, [#allocation4 + $0x1] }
  0x27   :  { %s93_s10 = sshll.u32 %s83_s11, 4  ;;  %s102_s20 = scalar_lea.hbm %s1853_s1, %s1462_s16  ;;  %s94_s10 = int_to_ptr.hbm [resolvable:$true] %s93_s10 }
  0x28   :  { %s112_s22 = sshll.u32 %s102_s20, 4  ;;  %s998_s23 = sshra.s32 %s94_s10, 4  ;;  %s999_s23 = int_to_ptr.hbm [resolvable:$true] %s998_s23  ;;  %s113_s22 = int_to_ptr.hbm [resolvable:$true] %s112_s22 }
  0x29   :  { %s1000_s24 = scalar_lea.hbm %s999_s23, 1  ;;  %p1003_p11 = scmp.lt.s32.totalorder %s999_s23, %s1853_s1 }
  0x2a   :  { %p1001_p10 = scmp.ne.s32.totalorder %s999_s23, %s1000_s24  ;;  %p1004_p12 = scmp.lt.s32.totalorder %s1476_s7, %s1000_s24 }
  0x2c   :  { %p1005_p13 = por %p1004_p12, %p1003_p11 }
  0x2e   :  { %p1006_p0 = pnand %p1005_p13, %p1001_p10 }
  0x30   :  { %1009 = shalt.err (!%p1006_p0)  }
  0x31   :  { %98 = dma.hbm_to_vmem [thread:$0]  %s94_s10, 16, %s96_s15, [#allocation4 + $0x2] }
  0x32   :  { %s1022_s13 = sshra.s32 %s113_s22, 4  ;;  %s1023_s13 = int_to_ptr.hbm [resolvable:$true] %s1022_s13 }
  0x33   :  { %s1024_s16 = scalar_lea.hbm %s1023_s13, 1  ;;  %p1027_p2 = scmp.lt.s32.totalorder %s1023_s13, %s1853_s1 }
  0x34   :  { %p1025_p1 = scmp.ne.s32.totalorder %s1023_s13, %s1024_s16  ;;  %p1028_p3 = scmp.lt.s32.totalorder %s1476_s7, %s1024_s16 }
  0x36   :  { %p1029_p4 = por %p1028_p3, %p1027_p2 }
  0x38   :  { %p1030_p5 = pnand %p1029_p4, %p1025_p1 }
  0x3a   :  { %1033 = shalt.err (!%p1030_p5)  }
  0x3b   :  { %117 = dma.hbm_to_vmem [thread:$0]  %s113_s22, 16, %s115_s21, [#allocation4 + $0x3] }
  0x3c   :  { %s752_s29 = sld [smem:[#allocation6 + $0x200]]  ;;  %s1403_s30 = smov [#allocation2 + $0x4]  }
  0x3d   :  { %s133_s0 = sshll.u32 %s1403_s30, 4  ;;  %s753_s8 = sld [smem:[#allocation6 + $0x280]]  ;;  %s134_s0 = int_to_ptr.vmem [resolvable:$true] %s133_s0 }
  0x3e   :  { %s1404_s15 = smov [#allocation2 + $0x5]   ;;  %s1511_s9 = sld [smem:[#allocation6 + $0x300]] }
  0x3f   :  { %s1509_s5 = sshll.u32 %s1404_s15, 4  ;;  %s1405_s11 = smov [#allocation2 + $0x6]   ;;  %s153_s5 = int_to_ptr.vmem [resolvable:$true] %s1509_s5 }
  0x40   :  { %s1514_s12 = sshll.u32 %s1405_s11, 4  ;;  %s1516_s14 = sld [smem:[#allocation6 + $0x380]]  ;;  %s172_s12 = int_to_ptr.vmem [resolvable:$true] %s1514_s12 }
  0x42   :  { %s121_s18 = scalar_lea.hbm %s1853_s1, %s752_s29 }
  0x43   :  { %s131_s10 = sshll.u32 %s121_s18, 4  ;;  %s140_s20 = scalar_lea.hbm %s1853_s1, %s753_s8  ;;  %s132_s10 = int_to_ptr.hbm [resolvable:$true] %s131_s10 }
  0x44   :  { %s150_s22 = sshll.u32 %s140_s20, 4  ;;  %s1046_s23 = sshra.s32 %s132_s10, 4  ;;  %s1047_s23 = int_to_ptr.hbm [resolvable:$true] %s1046_s23  ;;  %s151_s22 = int_to_ptr.hbm [resolvable:$true] %s150_s22 }
  0x45   :  { %s1048_s24 = scalar_lea.hbm %s1047_s23, 1  ;;  %p1051_p7 = scmp.lt.s32.totalorder %s1047_s23, %s1853_s1 }
  0x46   :  { %p1049_p6 = scmp.ne.s32.totalorder %s1047_s23, %s1048_s24  ;;  %p1052_p8 = scmp.lt.s32.totalorder %s1476_s7, %s1048_s24 }
  0x48   :  { %p1053_p9 = por %p1052_p8, %p1051_p7 }
  0x4a   :  { %p1054_p10 = pnand %p1053_p9, %p1049_p6 }
  0x4c   :  { %1057 = shalt.err (!%p1054_p10)  }
  0x4d   :  { %136 = dma.hbm_to_vmem [thread:$0]  %s132_s10, 16, %s134_s0, [#allocation4 + $0x4] }
  0x4e   :  { %s159_s26 = scalar_lea.hbm %s1853_s1, %s1511_s9  ;;  %s1070_s28 = sshra.s32 %s151_s22, 4  ;;  %s1071_s28 = int_to_ptr.hbm [resolvable:$true] %s1070_s28 }
  0x4f   :  { %s1072_s29 = scalar_lea.hbm %s1071_s28, 1  ;;  %p1075_p12 = scmp.lt.s32.totalorder %s1071_s28, %s1853_s1 }
  0x50   :  { %p1073_p11 = scmp.ne.s32.totalorder %s1071_s28, %s1072_s29  ;;  %p1076_p13 = scmp.lt.s32.totalorder %s1476_s7, %s1072_s29 }
  0x52   :  { %p1077_p0 = por %p1076_p13, %p1075_p12 }
  0x54   :  { %p1078_p1 = pnand %p1077_p0, %p1073_p11 }
  0x56   :  { %1081 = shalt.err (!%p1078_p1)  }
  0x57   :  { %155 = dma.hbm_to_vmem [thread:$0]  %s151_s22, 16, %s153_s5, [#allocation4 + $0x5] }
  0x58   :  { %s169_s0 = sshll.u32 %s159_s26, 4  ;;  %s178_s11 = scalar_lea.hbm %s1853_s1, %s1516_s14  ;;  %s170_s0 = int_to_ptr.hbm [resolvable:$true] %s169_s0 }
  0x59   :  { %s188_s21 = sshll.u32 %s178_s11, 4  ;;  %s1094_s17 = sshra.s32 %s170_s0, 4  ;;  %s1095_s17 = int_to_ptr.hbm [resolvable:$true] %s1094_s17  ;;  %s189_s21 = int_to_ptr.hbm [resolvable:$true] %s188_s21 }
  0x5a   :  { %s1096_s18 = scalar_lea.hbm %s1095_s17, 1  ;;  %p1099_p3 = scmp.lt.s32.totalorder %s1095_s17, %s1853_s1 }
  0x5b   :  { %p1097_p2 = scmp.ne.s32.totalorder %s1095_s17, %s1096_s18  ;;  %p1100_p4 = scmp.lt.s32.totalorder %s1476_s7, %s1096_s18 }
  0x5d   :  { %p1101_p5 = por %p1100_p4, %p1099_p3 }
  0x5f   :  { %p1102_p6 = pnand %p1101_p5, %p1097_p2 }
  0x61   :  { %1105 = shalt.err (!%p1102_p6)  }
  0x62   :  { %174 = dma.hbm_to_vmem [thread:$0]  %s170_s0, 16, %s172_s12, [#allocation4 + $0x6] }
  0x63   :  { %s1406_s5 = smov [#allocation2 + $0x7]   ;;  %s1118_s2 = sshra.s32 %s189_s21, 4  ;;  %s1119_s2 = int_to_ptr.hbm [resolvable:$true] %s1118_s2 }
  0x64   :  { %s190_s14 = sshll.u32 %s1406_s5, 4  ;;  %s1120_s20 = scalar_lea.hbm %s1119_s2, 1  ;;  %s191_s14 = int_to_ptr.vmem [resolvable:$true] %s190_s14 }
  0x65   :  { %p1121_p7 = scmp.ne.s32.totalorder %s1119_s2, %s1120_s20  ;;  %p1123_p8 = scmp.lt.s32.totalorder %s1119_s2, %s1853_s1 }
  0x66   :  { %p1124_p9 = scmp.lt.s32.totalorder %s1476_s7, %s1120_s20 }
  0x68   :  { %p1125_p10 = por %p1124_p9, %p1123_p8 }
  0x6a   :  { %p1126_p11 = pnand %p1125_p10, %p1121_p7 }
  0x6c   :  { %1129 = shalt.err (!%p1126_p11)  }
  0x6d   :  { %193 = dma.hbm_to_vmem [thread:$0]  %s189_s21, 16, %s191_s14, [#allocation4 + $0x7] }
  0x6e   :  { %s1553_s24 = smov 0  }
  0x6f LB: > { %p201_p12 = scmp.lt.s32.totalorder %s1392_s24, 0  ;;  %s202_s12 = ssub.s32 0, %s1392_s24  ;;  %s1392_s24 = sphi %s1553_s24, %s1567_s24  }
  0x70   : > { %s756_s25 = smin.u32 %s1392_s24, %s202_s12 }
  0x71   : > { %s204_s27 = sand.u32 1, %s756_s25  }
  0x72   : > { %s205_s13 = ssub.s32 0, %s204_s27 }
  0x73   : > { %s1861_s13 = smov (!%p201_p12, %s205_s13), %s204_s27 }
  0x74   : > { %p758_p13 = scmp.lt.s32.totalorder %s1861_s13, 0  ;;  %s211_s16 = sadd.s32 2, %s1861_s13 }
  0x76   : > { %s1863_s16 = smov (!%p758_p13, %s211_s16), %s1861_s13 }
  0x77   : > { %s759_s26 = sshll.u32 %s1863_s16, 3 }
  0x78   : > { %s214_s28 = scalar_lea.sflag [#allocation4], %s759_s26 }
  0x79   : > { %1374 = dma.done.wait %s214_s28, 16 }
  0x7a   : > { %1375 = vsyncadd %s214_s28, 4294967280  ;;  %s669_s29 = scalar_lea.sflag %s214_s28, 1 [#allocation4] }
  0x7b   : > { %1376 = dma.done.wait %s669_s29, 16 }
  0x7c   : > { %1377 = vsyncadd %s669_s29, 4294967280  ;;  %s672_s30 = scalar_lea.sflag %s214_s28, 2 [#allocation4] }
  0x7d   : > { %1378 = dma.done.wait %s672_s30, 16 }
  0x7e   : > { %1379 = vsyncadd %s672_s30, 4294967280  ;;  %s675_s8 = scalar_lea.sflag %s214_s28, 3 [#allocation4] }
  0x7f   : > { %1380 = dma.done.wait %s675_s8, 16 }
  0x80   : > { %1381 = vsyncadd %s675_s8, 4294967280  ;;  %s678_s0 = scalar_lea.sflag %s214_s28, 4 [#allocation4] }
  0x81   : > { %1382 = dma.done.wait %s678_s0, 16 }
  0x82   : > { %1383 = vsyncadd %s678_s0, 4294967280  ;;  %s681_s15 = scalar_lea.sflag %s214_s28, 5 [#allocation4] }
  0x83   : > { %1384 = dma.done.wait %s681_s15, 16 }
  0x84   : > { %1385 = vsyncadd %s681_s15, 4294967280  ;;  %s684_s9 = scalar_lea.sflag %s214_s28, 6 [#allocation4] }
  0x85   : > { %1386 = dma.done.wait %s684_s9, 16 }
  0x86   : > { %1387 = vsyncadd %s684_s9, 4294967280  ;;  %s687_s11 = scalar_lea.sflag %s214_s28, 7 [#allocation4] }
  0x87   : > { %1388 = dma.done.wait %s687_s11, 16 }
  0x88   : > { %1389 = vsyncadd %s687_s11, 4294967280  ;;  %s1567_s24 = sadd.s32 1, %s1392_s24   ;;  %s251_s21 = ssub.s32 1, %s1863_s16 }
  0x89   : > { %p767_p0 = scmp.ge.s32.totalorder %s1567_s24, 10  ;;  %p886_p1 = scmp.lt.s32.totalorder %s1567_s24, 10 }
  0x8a   : > { %s252_s17 = sshra.s32 %s1567_s24, 7  ;;  %s1574_s18 = sand.u32 127, %s1567_s24 }
  0x8b   : > { %s1576_s10 = sshll.u32 %s252_s17, 7  ;;  %s769_s19 = sshll.u32 %s251_s21, 3 }
  0x8c   : > { %s258_s5 = sadd.s32 %s1576_s10, %s1574_s18  ;;  %s1584_s2 = scalar_lea.vmem [#allocation2], %s769_s19 }
  0x8d   : > { %s862_s14 = scalar_select %p886_p1, [#allocation6], [#allocation44] }
  0x8e   : > { %s1865_s5 = smov (!%p886_p1, %s258_s5), 0  ;;  %s273_s20 = sshll.u32 %s1584_s2, 4  ;;  %s1587_s20 = int_to_ptr.vmem [resolvable:$true] %s273_s20 }
  0x8f   : > { %s259_s22 = sld [smem:[%s862_s14 + %s1865_s5]]  ;;  %s840_s23 = sadd.s32 128, %s1576_s10 }
  0x90   : > { %s696_s12 = scalar_lea.vmem %s1584_s2, 1 [#allocation2]  ;;  %s279_s25 = sadd.s32 %s840_s23, %s1574_s18 }
  0x91   : > { %s1592_s27 = scalar_lea.sflag [#allocation4], %s769_s19  ;;  %s1867_s25 = smov (!%p886_p1, %s279_s25), 0 }
  0x92   : > { %s699_s13 = scalar_lea.sflag %s1592_s27, 1 [#allocation4]  ;;  %s1599_s29 = sshll.u32 %s696_s12, 4  ;;  %s295_s29 = int_to_ptr.vmem [resolvable:$true] %s1599_s29 }
  0x93   : > { %s865_s28 = scalar_select %p886_p1, [#allocation6], [#allocation45] }
  0x94   : > { %s842_s30 = sadd.s32 256, %s1576_s10 }
  0x95   : > { %s260_s15 = scalar_lea.hbm %s1853_s1, %s259_s22  ;;  %s1605_s9 = sld [smem:[%s865_s28 + %s1867_s25]] }
  0x96   : > { %s1607_s11 = sshll.u32 %s260_s15, 4  ;;  %s300_s21 = sadd.s32 %s842_s30, %s1574_s18  ;;  %s272_s11 = int_to_ptr.hbm [resolvable:$true] %s1607_s11 }
  0x97   : > { %s1142_s17 = sshra.s32 %s272_s11, 4  ;;  %s1143_s17 = int_to_ptr.hbm [resolvable:$true] %s1142_s17 }
  0x98   : > { %s1144_s19 = scalar_lea.hbm %s1143_s17, 1  ;;  %p1149_p5 = scmp.lt.s32.totalorder %s1143_s17, %s1853_s1 }
  0x99   : > { %p1145_p2 = scmp.ne.s32.totalorder %s1143_s17, %s1144_s19  ;;  %p1150_p6 = scmp.lt.s32.totalorder %s1476_s7, %s1144_s19 }
  0x9b   : > { %p1146_p3 = pnand %p1145_p2, %p886_p1  ;;  %p1151_p7 = por %p1150_p6, %p1149_p5 }
  0x9d   : > { %p1147_p4 = pneg %p1146_p3 }
  0x9f   : > { %p1152_p8 = pnand %p1151_p7, %p1147_p4 }
  0xa1   : > { %1155 = shalt.err (!%p1152_p8)  }
  0xa2   : > { %s1156_s22 = sshra.s32 %s1587_s20, 4  ;;  %s1407_s12 = smov [#allocation2]   ;;  %s1157_s22 = int_to_ptr.vmem [resolvable:$true] %s1156_s22 }
  0xa3   : > { %s1158_s23 = scalar_lea.vmem %s1157_s22, 1  ;;  %s1621_s25 = scalar_lea.vmem %s1407_s12, 16 }
  0xa4   : > { %p1159_p9 = scmp.ne.s32.totalorder %s1157_s22, %s1158_s23  ;;  %p1163_p12 = scmp.lt.s32.totalorder %s1157_s22, [#allocation2] }
  0xa5   : > { %p1164_p13 = scmp.lt.s32.totalorder %s1621_s25, %s1158_s23 }
  0xa6   : > { %p1160_p10 = pnand %p1159_p9, %p886_p1 }
  0xa7   : > { %p1165_p2 = por %p1164_p13, %p1163_p12 }
  0xa8   : > { %p1161_p11 = pneg %p1160_p10 }
  0xaa   : > { %p1166_p3 = pnand %p1165_p2, %p1161_p11 }
  0xac   : > { %1169 = shalt.err (!%p1166_p3)  }
  0xad   : > { %864 = dma.hbm_to_vmem [thread:$0]  (%p886_p1), %s272_s11, 16, %s1587_s20, %s1592_s27 }
  0xae   : > { %s868_s28 = scalar_select %p886_p1, [#allocation6], [#allocation46] }
  0xaf   : > { %s1869_s21 = smov (!%p886_p1, %s300_s21), 0  ;;  %s281_s0 = scalar_lea.hbm %s1853_s1, %s1605_s9 }
  0xb0   : > { %s703_s15 = scalar_lea.vmem %s1584_s2, 2 [#allocation2]  ;;  %s292_s17 = sshll.u32 %s281_s0, 4  ;;  %s293_s17 = int_to_ptr.hbm [resolvable:$true] %s292_s17 }
  0xb1   : > { %s1637_s19 = sld [smem:[%s868_s28 + %s1869_s21]]  ;;  %s1170_s5 = sshra.s32 %s293_s17, 4  ;;  %s1171_s5 = int_to_ptr.hbm [resolvable:$true] %s1170_s5 }
  0xb2   : > { %s1172_s14 = scalar_lea.hbm %s1171_s5, 1  ;;  %p1177_p7 = scmp.lt.s32.totalorder %s1171_s5, %s1853_s1 }
  0xb3   : > { %p1173_p4 = scmp.ne.s32.totalorder %s1171_s5, %s1172_s14  ;;  %p1178_p8 = scmp.lt.s32.totalorder %s1476_s7, %s1172_s14 }
  0xb5   : > { %p1174_p5 = pnand %p1173_p4, %p886_p1  ;;  %p1179_p9 = por %p1178_p8, %p1177_p7 }
  0xb7   : > { %p1175_p6 = pneg %p1174_p5 }
  0xb9   : > { %p1180_p10 = pnand %p1179_p9, %p1175_p6 }
  0xbb   : > { %1183 = shalt.err (!%p1180_p10)  }
  0xbc   : > { %s1184_s9 = sshra.s32 %s295_s29, 4  ;;  %s1185_s9 = int_to_ptr.vmem [resolvable:$true] %s1184_s9 }
  0xbd   : > { %s1186_s21 = scalar_lea.vmem %s1185_s9, 1  ;;  %p1191_p2 = scmp.lt.s32.totalorder %s1185_s9, [#allocation2] }
  0xbe   : > { %p1187_p11 = scmp.ne.s32.totalorder %s1185_s9, %s1186_s21  ;;  %p1192_p3 = scmp.lt.s32.totalorder %s1621_s25, %s1186_s21 }
  0xc0   : > { %p1188_p12 = pnand %p1187_p11, %p886_p1  ;;  %p1193_p4 = por %p1192_p3, %p1191_p2 }
  0xc2   : > { %p1189_p13 = pneg %p1188_p12 }
  0xc4   : > { %p1194_p5 = pnand %p1193_p4, %p1189_p13 }
  0xc6   : > { %1197 = shalt.err (!%p1194_p5)  }
  0xc7   : > { %867 = dma.hbm_to_vmem [thread:$0]  (%p886_p1), %s293_s17, 16, %s295_s29, %s699_s13 }
  0xc8   : > { %s1656_s22 = sshll.u32 %s703_s15, 4  ;;  %s706_s23 = scalar_lea.sflag %s1592_s27, 2 [#allocation4]  ;;  %s316_s22 = int_to_ptr.vmem [resolvable:$true] %s1656_s22 }
  0xc9   : > { %s844_s12 = sadd.s32 384, %s1576_s10  ;;  %s302_s0 = scalar_lea.hbm %s1853_s1, %s1637_s19 }
  0xca   : > { %s1662_s28 = scalar_select %p886_p1, [#allocation6], [#allocation47] }
  0xcb   : > { %s313_s5 = sshll.u32 %s302_s0, 4  ;;  %s321_s14 = sadd.s32 %s844_s12, %s1574_s18  ;;  %s314_s5 = int_to_ptr.hbm [resolvable:$true] %s313_s5 }
  0xcc   : > { %s710_s20 = scalar_lea.vmem %s1584_s2, 3 [#allocation2]  ;;  %s1198_s11 = sshra.s32 %s314_s5, 4  ;;  %s1199_s11 = int_to_ptr.hbm [resolvable:$true] %s1198_s11 }
  0xcd   : > { %s1200_s13 = scalar_lea.hbm %s1199_s11, 1  ;;  %p1205_p9 = scmp.lt.s32.totalorder %s1199_s11, %s1853_s1 }
  0xce   : > { %p1201_p6 = scmp.ne.s32.totalorder %s1199_s11, %s1200_s13  ;;  %p1206_p10 = scmp.lt.s32.totalorder %s1476_s7, %s1200_s13 }
  0xd0   : > { %p1202_p7 = pnand %p1201_p6, %p886_p1  ;;  %p1207_p11 = por %p1206_p10, %p1205_p9 }
  0xd2   : > { %p1203_p8 = pneg %p1202_p7 }
  0xd4   : > { %p1208_p12 = pnand %p1207_p11, %p1203_p8 }
  0xd6   : > { %1211 = shalt.err (!%p1208_p12)  }
  0xd7   : > { %s1212_s17 = sshra.s32 %s316_s22, 4  ;;  %s1213_s17 = int_to_ptr.vmem [resolvable:$true] %s1212_s17 }
  0xd8   : > { %s1214_s19 = scalar_lea.vmem %s1213_s17, 1  ;;  %p1219_p4 = scmp.lt.s32.totalorder %s1213_s17, [#allocation2] }
  0xd9   : > { %p1215_p13 = scmp.ne.s32.totalorder %s1213_s17, %s1214_s19  ;;  %p1220_p5 = scmp.lt.s32.totalorder %s1621_s25, %s1214_s19 }
  0xdb   : > { %p1216_p2 = pnand %p1215_p13, %p886_p1  ;;  %p1221_p6 = por %p1220_p5, %p1219_p4 }
  0xdd   : > { %p1217_p3 = pneg %p1216_p2 }
  0xdf   : > { %p1222_p7 = pnand %p1221_p6, %p1217_p3 }
  0xe1   : > { %1225 = shalt.err (!%p1222_p7)  }
  0xe2   : > { %870 = dma.hbm_to_vmem [thread:$0]  (%p886_p1), %s314_s5, 16, %s316_s22, %s706_s23 }
  0xe3   : > { %s1871_s14 = smov (!%p886_p1, %s321_s14), 0  ;;  %s1686_s9 = sshll.u32 %s710_s20, 4  ;;  %s337_s9 = int_to_ptr.vmem [resolvable:$true] %s1686_s9 }
  0xe4   : > { %s846_s21 = sadd.s32 512, %s1576_s10  ;;  %s322_s12 = sld [smem:[%s1662_s28 + %s1871_s14]] }
  0xe5   : > { %s342_s30 = sadd.s32 %s846_s21, %s1574_s18  ;;  %s717_s0 = scalar_lea.vmem %s1584_s2, 4 [#allocation2] }
  0xe6   : > { %s874_s8 = scalar_select %p886_p1, [#allocation6], [#allocation48] }
  0xe7   : > { %s1873_s30 = smov (!%p886_p1, %s342_s30), 0  ;;  %s713_s11 = scalar_lea.sflag %s1592_s27, 3 [#allocation4] }
  0xe8   : > { %s1697_s13 = sld [smem:[%s874_s8 + %s1873_s30]]  ;;  %s1700_s22 = sshll.u32 %s717_s0, 4  ;;  %s358_s22 = int_to_ptr.vmem [resolvable:$true] %s1700_s22 }
  0xe9   : > { %s720_s28 = scalar_lea.sflag %s1592_s27, 4 [#allocation4]  ;;  %s848_s29 = sadd.s32 640, %s1576_s10 }
  0xea   : > { %s323_s20 = scalar_lea.hbm %s1853_s1, %s322_s12 }
  0xeb   : > { %s334_s14 = sshll.u32 %s323_s20, 4  ;;  %s335_s14 = int_to_ptr.hbm [resolvable:$true] %s334_s14 }
  0xec   : > { %s1226_s15 = sshra.s32 %s335_s14, 4  ;;  %s1227_s15 = int_to_ptr.hbm [resolvable:$true] %s1226_s15 }
  0xed   : > { %s1228_s17 = scalar_lea.hbm %s1227_s15, 1  ;;  %p1233_p11 = scmp.lt.s32.totalorder %s1227_s15, %s1853_s1 }
  0xee   : > { %p1229_p8 = scmp.ne.s32.totalorder %s1227_s15, %s1228_s17  ;;  %p1234_p12 = scmp.lt.s32.totalorder %s1476_s7, %s1228_s17 }
  0xf0   : > { %p1230_p9 = pnand %p1229_p8, %p886_p1  ;;  %p1235_p13 = por %p1234_p12, %p1233_p11 }
  0xf2   : > { %p1231_p10 = pneg %p1230_p9 }
  0xf4   : > { %p1236_p2 = pnand %p1235_p13, %p1231_p10 }
  0xf6   : > { %1239 = shalt.err (!%p1236_p2)  }
  0xf7   : > { %s1240_s12 = sshra.s32 %s337_s9, 4  ;;  %s1241_s12 = int_to_ptr.vmem [resolvable:$true] %s1240_s12 }
  0xf8   : > { %s1242_s30 = scalar_lea.vmem %s1241_s12, 1  ;;  %p1247_p6 = scmp.lt.s32.totalorder %s1241_s12, [#allocation2] }
  0xf9   : > { %p1243_p3 = scmp.ne.s32.totalorder %s1241_s12, %s1242_s30  ;;  %p1248_p7 = scmp.lt.s32.totalorder %s1621_s25, %s1242_s30 }
  0xfb   : > { %p1244_p4 = pnand %p1243_p3, %p886_p1  ;;  %p1249_p8 = por %p1248_p7, %p1247_p6 }
  0xfd   : > { %p1245_p5 = pneg %p1244_p4 }
  0xff   : > { %p1250_p9 = pnand %p1249_p8, %p1245_p5 }
 0x101   : > { %1253 = shalt.err (!%p1250_p9)  }
 0x102   : > { %873 = dma.hbm_to_vmem [thread:$0]  (%p886_p1), %s335_s14, 16, %s337_s9, %s713_s11 }
 0x103   : > { %s344_s23 = scalar_lea.hbm %s1853_s1, %s1697_s13  ;;  %s1730_s5 = sadd.s32 %s848_s29, %s1574_s18 }
 0x104   : > { %s355_s20 = sshll.u32 %s344_s23, 4  ;;  %s724_s15 = scalar_lea.vmem %s1584_s2, 5 [#allocation2]  ;;  %s356_s20 = int_to_ptr.hbm [resolvable:$true] %s355_s20 }
 0x105   : > { %s850_s17 = sadd.s32 768, %s1576_s10  ;;  %s1254_s19 = sshra.s32 %s356_s20, 4  ;;  %s1255_s19 = int_to_ptr.hbm [resolvable:$true] %s1254_s19 }
 0x106   : > { %s1256_s21 = scalar_lea.hbm %s1255_s19, 1  ;;  %p1261_p13 = scmp.lt.s32.totalorder %s1255_s19, %s1853_s1 }
 0x107   : > { %p1257_p10 = scmp.ne.s32.totalorder %s1255_s19, %s1256_s21  ;;  %p1262_p2 = scmp.lt.s32.totalorder %s1476_s7, %s1256_s21 }
 0x109   : > { %p1258_p11 = pnand %p1257_p10, %p886_p1  ;;  %p1263_p3 = por %p1262_p2, %p1261_p13 }
 0x10b   : > { %p1259_p12 = pneg %p1258_p11 }
 0x10d   : > { %p1264_p4 = pnand %p1263_p3, %p1259_p12 }
 0x10f   : > { %1267 = shalt.err (!%p1264_p4)  }
 0x110   : > { %s1268_s9 = sshra.s32 %s358_s22, 4  ;;  %s1269_s9 = int_to_ptr.vmem [resolvable:$true] %s1268_s9 }
 0x111   : > { %s1270_s11 = scalar_lea.vmem %s1269_s9, 1  ;;  %p1275_p8 = scmp.lt.s32.totalorder %s1269_s9, [#allocation2] }
 0x112   : > { %p1271_p5 = scmp.ne.s32.totalorder %s1269_s9, %s1270_s11  ;;  %p1276_p9 = scmp.lt.s32.totalorder %s1621_s25, %s1270_s11 }
 0x114   : > { %p1272_p6 = pnand %p1271_p5, %p886_p1  ;;  %p1277_p10 = por %p1276_p9, %p1275_p8 }
 0x116   : > { %p1273_p7 = pneg %p1272_p6 }
 0x118   : > { %p1278_p11 = pnand %p1277_p10, %p1273_p7 }
 0x11a   : > { %1281 = shalt.err (!%p1278_p11)  }
 0x11b   : > { %876 = dma.hbm_to_vmem [thread:$0]  (%p886_p1), %s356_s20, 16, %s358_s22, %s720_s28 }
 0x11c   : > { %s877_s13 = scalar_select %p886_p1, [#allocation6], [#allocation49] }
 0x11d   : > { %s1875_s5 = smov (!%p886_p1, %s1730_s5), 0  ;;  %s384_s14 = sadd.s32 %s850_s17, %s1574_s18 }
 0x11e   : > { %s364_s29 = sld [smem:[%s877_s13 + %s1875_s5]]  ;;  %s1759_s8 = sshll.u32 %s724_s15, 4  ;;  %s379_s8 = int_to_ptr.vmem [resolvable:$true] %s1759_s8 }
 0x11f   : > { %s880_s0 = scalar_select %p886_p1, [#allocation6], [#allocation50] }
 0x120   : > { %s1877_s14 = smov (!%p886_p1, %s384_s14), 0  ;;  %s731_s19 = scalar_lea.vmem %s1584_s2, 6 [#allocation2] }
 0x121   : > { %s1765_s23 = sld [smem:[%s880_s0 + %s1877_s14]]  ;;  %s727_s22 = scalar_lea.sflag %s1592_s27, 5 [#allocation4] }
 0x122   : > { %s734_s5 = scalar_lea.sflag %s1592_s27, 6 [#allocation4]  ;;  %s1774_s15 = sshll.u32 %s731_s19, 4  ;;  %s400_s15 = int_to_ptr.vmem [resolvable:$true] %s1774_s15 }
 0x123   : > { %s852_s12 = sadd.s32 896, %s1576_s10 }
 0x124   : > { %s365_s17 = scalar_lea.hbm %s1853_s1, %s364_s29 }
 0x125   : > { %s376_s21 = sshll.u32 %s365_s17, 4  ;;  %s377_s21 = int_to_ptr.hbm [resolvable:$true] %s376_s21 }
 0x126   : > { %s1282_s30 = sshra.s32 %s377_s21, 4  ;;  %s1283_s30 = int_to_ptr.hbm [resolvable:$true] %s1282_s30 }
 0x127   : > { %s1284_s9 = scalar_lea.hbm %s1283_s30, 1  ;;  %p1289_p3 = scmp.lt.s32.totalorder %s1283_s30, %s1853_s1 }
 0x128   : > { %p1285_p12 = scmp.ne.s32.totalorder %s1283_s30, %s1284_s9  ;;  %p1290_p4 = scmp.lt.s32.totalorder %s1476_s7, %s1284_s9 }
 0x12a   : > { %p1286_p13 = pnand %p1285_p12, %p886_p1  ;;  %p1291_p5 = por %p1290_p4, %p1289_p3 }
 0x12c   : > { %p1287_p2 = pneg %p1286_p13 }
 0x12e   : > { %p1292_p6 = pnand %p1291_p5, %p1287_p2 }
 0x130   : > { %1295 = shalt.err (!%p1292_p6)  }
 0x131   : > { %s1296_s10 = sshra.s32 %s379_s8, 4  ;;  %s1297_s10 = int_to_ptr.vmem [resolvable:$true] %s1296_s10 }
 0x132   : > { %s1298_s14 = scalar_lea.vmem %s1297_s10, 1  ;;  %p1303_p10 = scmp.lt.s32.totalorder %s1297_s10, [#allocation2] }
 0x133   : > { %p1299_p7 = scmp.ne.s32.totalorder %s1297_s10, %s1298_s14  ;;  %p1304_p11 = scmp.lt.s32.totalorder %s1621_s25, %s1298_s14 }
 0x135   : > { %p1300_p8 = pnand %p1299_p7, %p886_p1  ;;  %p1305_p12 = por %p1304_p11, %p1303_p10 }
 0x137   : > { %p1301_p9 = pneg %p1300_p8 }
 0x139   : > { %p1306_p13 = pnand %p1305_p12, %p1301_p9 }
 0x13b   : > { %1309 = shalt.err (!%p1306_p13)  }
 0x13c   : > { %879 = dma.hbm_to_vmem [thread:$0]  (%p886_p1), %s377_s21, 16, %s379_s8, %s727_s22 }
 0x13d   : > { %s386_s19 = scalar_lea.hbm %s1853_s1, %s1765_s23  ;;  %s405_s20 = sadd.s32 %s852_s12, %s1574_s18 }
 0x13e   : > { %s397_s28 = sshll.u32 %s386_s19, 4  ;;  %s398_s28 = int_to_ptr.hbm [resolvable:$true] %s397_s28 }
 0x13f   : > { %s1310_s17 = sshra.s32 %s398_s28, 4  ;;  %s1311_s17 = int_to_ptr.hbm [resolvable:$true] %s1310_s17 }
 0x140   : > { %s1312_s30 = scalar_lea.hbm %s1311_s17, 1  ;;  %p1317_p5 = scmp.lt.s32.totalorder %s1311_s17, %s1853_s1 }
 0x141   : > { %p1313_p2 = scmp.ne.s32.totalorder %s1311_s17, %s1312_s30  ;;  %p1318_p6 = scmp.lt.s32.totalorder %s1476_s7, %s1312_s30 }
 0x143   : > { %p1314_p3 = pnand %p1313_p2, %p886_p1  ;;  %p1319_p7 = por %p1318_p6, %p1317_p5 }
 0x145   : > { %p1315_p4 = pneg %p1314_p3 }
 0x147   : > { %p1320_p8 = pnand %p1319_p7, %p1315_p4 }
 0x149   : > { %1323 = shalt.err (!%p1320_p8)  }
 0x14a   : > { %s1324_s8 = sshra.s32 %s400_s15, 4  ;;  %s1325_s8 = int_to_ptr.vmem [resolvable:$true] %s1324_s8 }
 0x14b   : > { %s1326_s18 = scalar_lea.vmem %s1325_s8, 1  ;;  %p1331_p12 = scmp.lt.s32.totalorder %s1325_s8, [#allocation2] }
 0x14c   : > { %p1327_p9 = scmp.ne.s32.totalorder %s1325_s8, %s1326_s18  ;;  %p1332_p13 = scmp.lt.s32.totalorder %s1621_s25, %s1326_s18 }
 0x14e   : > { %p1328_p10 = pnand %p1327_p9, %p886_p1  ;;  %p1333_p2 = por %p1332_p13, %p1331_p12 }
 0x150   : > { %p1329_p11 = pneg %p1328_p10 }
 0x152   : > { %p1334_p3 = pnand %p1333_p2, %p1329_p11 }
 0x154   : > { %1337 = shalt.err (!%p1334_p3)  }
 0x155   : > { %882 = dma.hbm_to_vmem [thread:$0]  (%p886_p1), %s398_s28, 16, %s400_s15, %s734_s5 }
 0x156   : > { %s883_s23 = scalar_select %p886_p1, [#allocation6], [#allocation51] }
 0x157   : > { %s1879_s20 = smov (!%p886_p1, %s405_s20), 0  ;;  %s738_s21 = scalar_lea.vmem %s1584_s2, 7 [#allocation2] }
 0x158   : > { %s406_s22 = sld [smem:[%s883_s23 + %s1879_s20]]  ;;  %s1818_s12 = sshll.u32 %s738_s21, 4  ;;  %s421_s12 = int_to_ptr.vmem [resolvable:$true] %s1818_s12 }
 0x159   : > { %s741_s13 = scalar_lea.sflag %s1592_s27, 7 [#allocation4] }
 0x15e   : > { %s407_s29 = scalar_lea.hbm %s1853_s1, %s406_s22 }
 0x15f   : > { %s418_s0 = sshll.u32 %s407_s29, 4  ;;  %s419_s0 = int_to_ptr.hbm [resolvable:$true] %s418_s0 }
 0x160   : > { %s1338_s19 = sshra.s32 %s419_s0, 4  ;;  %s1339_s19 = int_to_ptr.hbm [resolvable:$true] %s1338_s19 }
 0x161   : > { %s1340_s5 = scalar_lea.hbm %s1339_s19, 1  ;;  %p1345_p7 = scmp.lt.s32.totalorder %s1339_s19, %s1853_s1 }
 0x162   : > { %p1341_p4 = scmp.ne.s32.totalorder %s1339_s19, %s1340_s5  ;;  %p1346_p8 = scmp.lt.s32.totalorder %s1476_s7, %s1340_s5 }
 0x164   : > { %p1342_p5 = pnand %p1341_p4, %p886_p1  ;;  %p1347_p9 = por %p1346_p8, %p1345_p7 }
 0x166   : > { %p1343_p6 = pneg %p1342_p5 }
 0x168   : > { %p1348_p10 = pnand %p1347_p9, %p1343_p6 }
 0x16a   : > { %1351 = shalt.err (!%p1348_p10)  }
 0x16b   : > { %s1352_s27 = sshra.s32 %s421_s12, 4  ;;  %s1353_s27 = int_to_ptr.vmem [resolvable:$true] %s1352_s27 }
 0x16c   : > { %s1354_s28 = scalar_lea.vmem %s1353_s27, 1  ;;  %p1359_p2 = scmp.lt.s32.totalorder %s1353_s27, [#allocation2] }
 0x16d   : > { %p1355_p11 = scmp.ne.s32.totalorder %s1353_s27, %s1354_s28  ;;  %p1360_p3 = scmp.lt.s32.totalorder %s1621_s25, %s1354_s28 }
 0x16f   : > { %p1356_p12 = pnand %p1355_p11, %p886_p1  ;;  %p1361_p4 = por %p1360_p3, %p1359_p2 }
 0x171   : > { %p1357_p13 = pneg %p1356_p12 }
 0x173   : > { %p1362_p5 = pnand %p1361_p4, %p1357_p13 }
 0x175   : > { %1365 = shalt.err (!%p1362_p5)  }
 0x176   : > { %885 = dma.hbm_to_vmem [thread:$0]  (%p886_p1), %s419_s0, 16, %s421_s12, %s741_s13  ;;  %v426_v1 = vld [vmem:[#allocation3] sm:$0xff]  ;;  %v859_v5 = vld [vmem:[#allocation8 + $0x30] sm:$0xff] (%p767_p0)  ;;  %v858_v6 = vld [vmem:[#allocation8 + $0x28] sm:$0xff] (%p767_p0)  ;;  %vm539_vm1 = vcmask (%p767_p0), 7168  }
 0x177   : > { %s424_s20 = scalar_lea.vmem [#allocation2], %s759_s26  ;;  %199 = sbr.rel (!%p767_p0) target bundleno = 111 (0x6f), region = 185  ;;  %v860_v4 = vld [vmem:[#allocation8 + $0x38] sm:$0xff] (%p767_p0)  ;;  %v857_v7 = vld [vmem:[#allocation8 + $0x20] sm:$0xff] (%p767_p0)  ;;  %v855_v9 = vld [vmem:[#allocation8 + $0x10] sm:$0xff] (%p767_p0) }
 0x178   : > { %v425_v2 = vld [vmem:[%s424_s20] sm:$0xff]  ;;  %500 = vmatpush.bf16.msra.mxu0 (%p767_p0), %v860_v4  ;;  %v856_v8 = vld [vmem:[#allocation8 + $0x18] sm:$0xff] (%p767_p0)  ;;  %v853_v13 = vld [vmem:[#allocation8] sm:$0xff] (%p767_p0)  ;;  %s521_s26 = sld [smem:[#allocation7]] (%p767_p0) }
 0x179   : > { %v427_v3 = vadd.f32 %v426_v1, %v425_v2  ;;  %v854_v10 = vld [vmem:[#allocation8 + $0x8] sm:$0xff] (%p767_p0) }
 0x17a   :  { %v908_v15 = vld [vmem:[%s1855_s3] ss:$0 sm:$0xff] (%p767_p0) }
 0x17b   : > { %428 = vst [vmem:[#allocation3] sm:$0xff] %v427_v3  ;;  %v909_v18 = vld [vmem:[%s1856_s4] ss:$0 sm:$0xff] (%p767_p0) }
 0x17c   :  { %501 = vmatpush.bf16.msra.mxu0 %v859_v5 }
 0x17e   :  { %v522_v22 = vstv %s521_s26 }
 0x180   :  { %502 = vmatpush.bf16.msra.mxu0 %v858_v6 }
 0x182   :  { %v429_v11 = vld [vmem:[#allocation3] sm:$0xff] }
 0x183   :  { %v430_v12 = vmul.f32 0.1, %v429_v11 }
 0x184   :  { %503 = vmatpush.bf16.msra.mxu0 %v857_v7 }
 0x185   :  { %v431_v14 = vpack.c.bf16 %v430_v12, %v430_v12 }
 0x188   :  { %504 = vmatpush.bf16.msra.mxu0 %v856_v8 }
 0x18c   :  { %505 = vmatpush.bf16.msra.mxu0 %v855_v9 }
 0x190   :  { %506 = vmatpush.bf16.msra.mxu0 %v854_v10 }
 0x194   :  { %507 = vmatpush.bf16.msra.mxu0 %v853_v13 }
 0x197   :  { %508 = vmatmul.bf16.vlgmr.msra.gmra.mxu0 %v431_v14 }
 0x214   :  { %v509_v16 = vpop.f32.mrf.mxu0 }
 0x215   :  { %v510_v17 = vadd.f32 %v908_v15, %v509_v16 }
 0x217   :  { %v513_v19 = vmax.f32 %v510_v17, 0.0 }
 0x219   :  { %v518_v20 = vmul.f32 %v909_v18, %v513_v19 }
 0x21b   :  { %519 = vadd.xlane.f32.xlu0 %v518_v20 }
 0x21c   :  { %v511_v21 = vpop.f32.mrf.mxu0 }
 0x28e   :  { %v520_v23 = vpop.xlane.xlu0 %519 }
 0x28f   :  { %v523_v24 = vadd.f32 %v522_v22, %v520_v23 }
 0x291   :  { %v525_v25 = vand.u32 2147483647, %v523_v24  ;;  %v524_v36 = vmin.f32 %v523_v24, 0.0 }
 0x293   :  { %v526_v26 = vsub.f32 0.0, %v525_v25 }
 0x295   :  { %v527_v27 = vmul.f32 1.442695, %v526_v26 }
 0x297   :  { %910 = vpow2.f32 %v527_v27 }
 0x29d   :  { %v911_v28 = vpop.eup %910 }
 0x29e   :  { %v529_v29 = vadd.f32 1.0, %v911_v28  ;;  %v532_v30 = vmul.f32 -0.5, %v911_v28  ;;  %v535_v32 = vand.u32 2147483647, %v911_v28 }
 0x2a0   :  { %912 = vlog2.f32 %v529_v29  ;;  %v533_v31 = vadd.f32 1.0, %v532_v30  ;;  %vm536_vm0 = vcmp.lt.f32.partialorder %v535_v32, 0.0004427343 }
 0x2a2   :  { %v534_v35 = vmul.f32 %v911_v28, %v533_v31 }
 0x2a6   :  { %v913_v33 = vpop.eup %912 }
 0x2a7   :  { %v531_v34 = vmul.f32 0.6931472, %v913_v33 }
 0x2a9   :  { %v537_v37 = vsel %vm536_vm0, %v534_v35, %v531_v34 }
 0x2aa   :  { %v538_v38 = vsub.f32 %v524_v36, %v537_v37 }
 0x2ac   :  { %540 = vst.msk [vmem:[%s1858_s6] sm:$0xff] %vm539_vm1, %v538_v38 }
 0x2ad   :  { %545 = vsyncpa [#allocation9], 1 }
 0x2ae   :  { %546 = vsyncmov [#allocation4] }
 0x2b1   :  { %s547_s25 = vpop.sfrf %546 }
 0x2b2   :  { %p823_p0 = scmp.ne.s32.totalorder %s547_s25, 0 }
 0x2b4   :  { %551 = shalt.err (%p823_p0)  }
 0x2b5   :  { %553 = vsyncmov [#allocation4 + $0x1] }
 0x2b8   :  { %s554_s30 = vpop.sfrf %553 }
 0x2b9   :  { %p824_p1 = scmp.ne.s32.totalorder %s554_s30, 0 }
 0x2bb   :  { %558 = shalt.err (%p824_p1)  }
 0x2bc   :  { %560 = vsyncmov [#allocation4 + $0x2] }
 0x2bf   :  { %s561_s9 = vpop.sfrf %560 }
 0x2c0   :  { %p825_p6 = scmp.ne.s32.totalorder %s561_s9, 0 }
 0x2c2   :  { %565 = shalt.err (%p825_p6)  }
 0x2c3   :  { %567 = vsyncmov [#allocation4 + $0x3] }
 0x2c6   :  { %s568_s11 = vpop.sfrf %567 }
 0x2c7   :  { %p826_p7 = scmp.ne.s32.totalorder %s568_s11, 0 }
 0x2c9   :  { %572 = shalt.err (%p826_p7)  }
 0x2ca   :  { %574 = vsyncmov [#allocation4 + $0x4] }
 0x2cd   :  { %s575_s8 = vpop.sfrf %574 }
 0x2ce   :  { %p827_p8 = scmp.ne.s32.totalorder %s575_s8, 0 }
 0x2d0   :  { %579 = shalt.err (%p827_p8)  }
 0x2d1   :  { %581 = vsyncmov [#allocation4 + $0x5] }
 0x2d4   :  { %s582_s6 = vpop.sfrf %581 }
 0x2d5   :  { %p828_p9 = scmp.ne.s32.totalorder %s582_s6, 0 }
 0x2d7   :  { %586 = shalt.err (%p828_p9)  }
 0x2d8   :  { %588 = vsyncmov [#allocation4 + $0x6] }
 0x2db   :  { %s589_s18 = vpop.sfrf %588 }
 0x2dc   :  { %p829_p10 = scmp.ne.s32.totalorder %s589_s18, 0 }
 0x2de   :  { %593 = shalt.err (%p829_p10)  }
 0x2df   :  { %595 = vsyncmov [#allocation4 + $0x7] }
 0x2e2   :  { %s596_s23 = vpop.sfrf %595 }
 0x2e3   :  { %p830_p11 = scmp.ne.s32.totalorder %s596_s23, 0 }
 0x2e5   :  { %600 = shalt.err (%p830_p11)  }
 0x2e6   :  { %602 = vsyncmov [#allocation4 + $0x8] }
 0x2e9   :  { %s603_s22 = vpop.sfrf %602 }
 0x2ea   :  { %p831_p12 = scmp.ne.s32.totalorder %s603_s22, 0 }
 0x2ec   :  { %607 = shalt.err (%p831_p12)  }
 0x2ed   :  { %609 = vsyncmov [#allocation4 + $0x9] }
 0x2f0   :  { %s610_s21 = vpop.sfrf %609 }
 0x2f1   :  { %p832_p13 = scmp.ne.s32.totalorder %s610_s21, 0 }
 0x2f3   :  { %614 = shalt.err (%p832_p13)  }
 0x2f4   :  { %616 = vsyncmov [#allocation4 + $0xa] }
 0x2f7   :  { %s617_s12 = vpop.sfrf %616 }
 0x2f8   :  { %p833_p2 = scmp.ne.s32.totalorder %s617_s12, 0 }
 0x2fa   :  { %621 = shalt.err (%p833_p2)  }
 0x2fb   :  { %623 = vsyncmov [#allocation4 + $0xb] }
 0x2fe   :  { %s624_s13 = vpop.sfrf %623 }
 0x2ff   :  { %p834_p3 = scmp.ne.s32.totalorder %s624_s13, 0 }
 0x301   :  { %628 = shalt.err (%p834_p3)  }
 0x302   :  { %630 = vsyncmov [#allocation4 + $0xc] }
 0x305   :  { %s631_s10 = vpop.sfrf %630 }
 0x306   :  { %p835_p4 = scmp.ne.s32.totalorder %s631_s10, 0 }
 0x308   :  { %635 = shalt.err (%p835_p4)  }
 0x309   :  { %637 = vsyncmov [#allocation4 + $0xd] }
 0x30c   :  { %s638_s14 = vpop.sfrf %637 }
 0x30d   :  { %p836_p5 = scmp.ne.s32.totalorder %s638_s14, 0 }
 0x30f   :  { %642 = shalt.err (%p836_p5)  }
 0x310   :  { %644 = vsyncmov [#allocation4 + $0xe] }
 0x313   :  { %s645_s29 = vpop.sfrf %644 }
 0x314   :  { %p837_p0 = scmp.ne.s32.totalorder %s645_s29, 0 }
 0x316   :  { %649 = shalt.err (%p837_p0)  }
 0x317   :  { %651 = vsyncmov [#allocation4 + $0xf] }
 0x31a   :  { %s652_s0 = vpop.sfrf %651 }
 0x31b   :  { %p838_p1 = scmp.ne.s32.totalorder %s652_s0, 0 }
 0x31d   :  { %656 = shalt.err (%p838_p1)  }

</bundles_post_ra>
